<compile_context>
chip_gen: v7x
topology: tpu7x:2x2x1
jax: 0.10.0
libtpu: 0.0.40
codegen_flags: <defaults>
</compile_context>

<pallas_src>
import functools

import jax
import jax.numpy as jnp
from jax.experimental import pallas as pl
from jax.experimental.pallas import tpu as pltpu


# ----------------------------------------------------------------------------
# Small helpers
# ----------------------------------------------------------------------------

def _bytes(shape, dtype):
    n = 1
    for d in shape:
        n *= int(d)
    return n * jnp.dtype(dtype).itemsize


def _compiler_params(sem, block_byte_estimate):
    # Derive the scoped-VMEM budget from the actual (double-buffered) block
    # footprint, with headroom; clamp to a range that is portable across
    # v5e/v6e (128 MiB physical) and v7x (64 MiB physical).
    limit = 2 * int(block_byte_estimate) + (4 << 20)
    limit = min(max(limit, 16 << 20), 64 << 20)
    return pltpu.CompilerParams(dimension_semantics=sem, vmem_limit_bytes=limit)


def _pick_tile(n, target):
    """Largest multiple-of-128 tile <= target dividing n (n assumed 128-aligned,
    else the full extent is used — only the mode axis may hit that branch)."""
    if n % 128 != 0:
        return n
    t = min(n, max(128, (target // 128) * 128))
    while n % t != 0:
        t -= 128
    return t


def _pad_lanes(x_cn):
    """Pad the trailing (lane) axis of a (C, N) array up to a multiple of 128."""
    n = x_cn.shape[-1]
    pad = (-n) % 128
    if pad:
        x_cn = jnp.pad(x_cn, ((0, 0), (0, pad)))
    return x_cn


# ----------------------------------------------------------------------------
# Pallas kernels (channels-first: rows = channels, lanes = flattened space N)
# ----------------------------------------------------------------------------

def _linear_cf_kernel(x_ref, w_ref, b_ref, o_ref, *, apply_relu, use_mxu):
    # (Cout, Cin) @ (Cin, TN) -> (Cout, TN); lane-dense output, f32 accumulation.
    if use_mxu:
        y = jnp.dot(w_ref[...].astype(jnp.bfloat16), x_ref[...].astype(jnp.bfloat16),
                    preferred_element_type=jnp.float32)
    else:
        # Tiny contraction (width <= 16): unrolled VPU MACs, no MXU push/pop.
        xf = x_ref[...].astype(jnp.float32)          # (Cin, TN)
        wf = w_ref[...].astype(jnp.float32)          # (Cout, Cin)
        y = jnp.zeros(o_ref.shape, jnp.float32)
        for c in range(xf.shape[0]):
            y = y + wf[:, c:c + 1] * xf[c:c + 1, :]
    y = y + b_ref[...]
    if apply_relu:
        y = jnp.maximum(y, 0.0)
    o_ref[...] = y.astype(o_ref.dtype)


def _fused_wadd_cf_kernel(x_ref, w_ref, b_ref, s_ref, o_ref, *, apply_relu, use_mxu):
    # relu( W @ x + b + spectral ) — fuses the 1x1 conv, residual add and ReLU.
    if use_mxu:
        y = jnp.dot(w_ref[...].astype(jnp.bfloat16), x_ref[...].astype(jnp.bfloat16),
                    preferred_element_type=jnp.float32)
    else:
        xf = x_ref[...].astype(jnp.float32)
        wf = w_ref[...].astype(jnp.float32)
        y = jnp.zeros(o_ref.shape, jnp.float32)
        for c in range(xf.shape[0]):
            y = y + wf[:, c:c + 1] * xf[c:c + 1, :]
    y = y + b_ref[...] + s_ref[...].astype(jnp.float32)
    if apply_relu:
        y = jnp.maximum(y, 0.0)
    o_ref[...] = y.astype(o_ref.dtype)


def _fc_head_kernel(x_ref, w1_ref, b1_ref, w2_ref, b2_ref, o_ref):
    # Fused fc1(+ReLU) -> fc2.  Hidden activation stays in vregs (TN kept small),
    # no explicit scratch round trip.
    x = x_ref[...].astype(jnp.bfloat16)
    h = jnp.dot(w1_ref[...].astype(jnp.bfloat16), x, preferred_element_type=jnp.float32)
    h = jnp.maximum(h + b1_ref[...], 0.0)
    y = jnp.dot(w2_ref[...].astype(jnp.bfloat16), h.astype(jnp.bfloat16),
                preferred_element_type=jnp.float32)
    o_ref[...] = (y + b2_ref[...]).astype(o_ref.dtype)


def _mode_mix_kernel(xr_ref, xi_ref, wr_ref, wi_ref, or_ref, oi_ref):
    # Complex per-Fourier-mode channel mixing, one batch element per grid step:
    #   out[d, m] = sum_c x[c, m] * w[c, d, m]        (complex)
    # xr/xi: (C, TM), wr/wi: (C, D, TM), out: (D, TM) — all lane-dense on M,
    # full sublane occupancy on C / D.  Pure VPU MACs, f32 accumulation.
    C = xr_ref.shape[0]
    acc_r = jnp.zeros(or_ref.shape, jnp.float32)
    acc_i = jnp.zeros(oi_ref.shape, jnp.float32)
    for c in range(C):
        xr = xr_ref[c:c + 1, :].astype(jnp.float32)   # (1, TM)
        xi = xi_ref[c:c + 1, :].astype(jnp.float32)
        wr = wr_ref[c].astype(jnp.float32)            # (D, TM)
        wi = wi_ref[c].astype(jnp.float32)
        acc_r = acc_r + wr * xr - wi * xi
        acc_i = acc_i + wr * xi + wi * xr
    or_ref[...] = acc_r
    oi_ref[...] = acc_i


# ----------------------------------------------------------------------------
# Pallas wrappers
# ----------------------------------------------------------------------------

def pallas_linear_cf(x_cn, w, b, *, apply_relu, out_dtype=jnp.bfloat16, tile_target=512):
    """x_cn: (Cin, N), w: (Cout, Cin), b: (Cout, 1) -> (Cout, N)."""
    Cin, N = x_cn.shape
    Cout = w.shape[0]
    x_p = _pad_lanes(x_cn)
    Np = x_p.shape[1]
    tn = _pick_tile(Np, tile_target)
    use_mxu = max(Cin, Cout) > 16
    kern = functools.partial(_linear_cf_kernel, apply_relu=apply_relu, use_mxu=use_mxu)
    vmem = (2 * (_bytes((Cin, tn), x_p.dtype) + _bytes((Cout, tn), out_dtype))
            + _bytes((Cout, Cin), w.dtype) + _bytes((Cout, 1), b.dtype))
    out = pl.pallas_call(
        kern,
        out_shape=jax.ShapeDtypeStruct((Cout, Np), out_dtype),
        grid=(Np // tn,),
        in_specs=[
            pl.BlockSpec((Cin, tn), lambda i: (0, i)),
            pl.BlockSpec((Cout, Cin), lambda i: (0, 0)),
            pl.BlockSpec((Cout, 1), lambda i: (0, 0)),
        ],
        out_specs=pl.BlockSpec((Cout, tn), lambda i: (0, i)),
        compiler_params=_compiler_params(("parallel",), vmem),
    )(x_p, w, b)
    return out[:, :N]


def pallas_fused_wadd_cf(x_cn, w, b, spec_cn, *, apply_relu,
                         out_dtype=jnp.bfloat16, tile_target=512):
    """relu(W @ x + b + spec).  x_cn: (Cin, N) bf16, spec_cn: (Cout, N) f32."""
    Cin, N = x_cn.shape
    Cout = w.shape[0]
    x_p = _pad_lanes(x_cn)
    s_p = _pad_lanes(spec_cn)
    Np = x_p.shape[1]
    tn = _pick_tile(Np, tile_target)
    use_mxu = max(Cin, Cout) > 16
    kern = functools.partial(_fused_wadd_cf_kernel, apply_relu=apply_relu, use_mxu=use_mxu)
    vmem = (2 * (_bytes((Cin, tn), x_p.dtype) + _bytes((Cout, tn), s_p.dtype)
                 + _bytes((Cout, tn), out_dtype))
            + _bytes((Cout, Cin), w.dtype) + _bytes((Cout, 1), b.dtype))
    out = pl.pallas_call(
        kern,
        out_shape=jax.ShapeDtypeStruct((Cout, Np), out_dtype),
        grid=(Np // tn,),
        in_specs=[
            pl.BlockSpec((Cin, tn), lambda i: (0, i)),
            pl.BlockSpec((Cout, Cin), lambda i: (0, 0)),
            pl.BlockSpec((Cout, 1), lambda i: (0, 0)),
            pl.BlockSpec((Cout, tn), lambda i: (0, i)),
        ],
        out_specs=pl.BlockSpec((Cout, tn), lambda i: (0, i)),
        compiler_params=_compiler_params(("parallel",), vmem),
    )(x_p, w, b, s_p)
    return out[:, :N]


def pallas_fc_head(x_cn, w1, b1, w2, b2, *, tile_target=256):
    """Fused fc1(+ReLU)->fc2.  x_cn: (Cin,N) bf16, w1: (H,Cin), w2: (Cout,H)."""
    Cin, N = x_cn.shape
    H = w1.shape[0]
    Cout = w2.shape[0]
    x_p = _pad_lanes(x_cn)
    Np = x_p.shape[1]
    tn = _pick_tile(Np, tile_target)   # small tile: (H, tn) hidden stays in vregs
    vmem = (2 * (_bytes((Cin, tn), x_p.dtype) + _bytes((Cout, tn), jnp.float32))
            + _bytes((H, Cin), w1.dtype) + _bytes((H, 1), b1.dtype)
            + _bytes((Cout, H), w2.dtype) + _bytes((Cout, 1), b2.dtype)
            + _bytes((H, tn), jnp.float32))
    out = pl.pallas_call(
        _fc_head_kernel,
        out_shape=jax.ShapeDtypeStruct((Cout, Np), jnp.float32),
        grid=(Np // tn,),
        in_specs=[
            pl.BlockSpec((Cin, tn), lambda i: (0, i)),
            pl.BlockSpec((H, Cin), lambda i: (0, 0)),
            pl.BlockSpec((H, 1), lambda i: (0, 0)),
            pl.BlockSpec((Cout, H), lambda i: (0, 0)),
            pl.BlockSpec((Cout, 1), lambda i: (0, 0)),
        ],
        out_specs=pl.BlockSpec((Cout, tn), lambda i: (0, i)),
        compiler_params=_compiler_params(("parallel",), vmem),
    )(x_p, w1, b1, w2, b2)
    return out[:, :N]


def pallas_mode_mix(xr, xi, wr, wi, *, tile_m=512):
    """xr/xi: (B, C, M) f32, wr/wi: (C, D, M) bf16 -> real & imag (B, D, M) f32.

    Grid = (M_tiles, B): M outer so the weight block stays resident across the
    batch loop; batch is a squeezed leading block dim so every kernel slab is
    dense (C, TM)/(D, TM)."""
    B, C, M = xr.shape
    D = wr.shape[1]
    tm = _pick_tile(M, tile_m)
    vmem = 2 * (2 * _bytes((C, tm), xr.dtype)
                + 2 * _bytes((C, D, tm), wr.dtype)
                + 2 * _bytes((D, tm), jnp.float32))
    return pl.pallas_call(
        _mode_mix_kernel,
        out_shape=(jax.ShapeDtypeStruct((B, D, M), jnp.float32),
                   jax.ShapeDtypeStruct((B, D, M), jnp.float32)),
        grid=(M // tm, B),
        in_specs=[
            pl.BlockSpec((None, C, tm), lambda m, b: (b, 0, m)),
            pl.BlockSpec((None, C, tm), lambda m, b: (b, 0, m)),
            pl.BlockSpec((C, D, tm), lambda m, b: (0, 0, m)),
            pl.BlockSpec((C, D, tm), lambda m, b: (0, 0, m)),
        ],
        out_specs=(pl.BlockSpec((None, D, tm), lambda m, b: (b, 0, m)),
                   pl.BlockSpec((None, D, tm), lambda m, b: (b, 0, m))),
        compiler_params=_compiler_params(("parallel", "parallel"), vmem),
    )(xr, xi, wr, wi)


# ----------------------------------------------------------------------------
# SpectralConv3d (FFT in plain JAX, per-mode channel mixing in Pallas)
# ----------------------------------------------------------------------------

def spectral_conv3d_cf(h_cn, wr_cdm, wi_cdm, B, X, Y, Z, m1, m2, m3):
    """h_cn: (C, N) (bf16 ok), wr/wi: (C, D, 4*m1*m2*m3) bf16.  Returns (D, N) f32."""
    C, N = h_cn.shape
    D = wr_cdm.shape[1]
    Kz = Z // 2 + 1
    assert X >= 2 * m1 and Y >= 2 * m2 and Kz >= m3

    x5 = h_cn.reshape(C, B, X, Y, Z).astype(jnp.float32)
    # TODO(synk): 3D rfftn/irfftn have no Pallas TPU equivalent; kept in plain JAX/XLA.
    x_ft = jnp.fft.rfftn(x5, axes=(2, 3, 4), norm="forward")      # (C,B,X,Y,Kz) c64

    corners = jnp.stack(
        [x_ft[:, :, :m1, :m2, :m3],
         x_ft[:, :, -m1:, :m2, :m3],
         x_ft[:, :, :m1, -m2:, :m3],
         x_ft[:, :, -m1:, -m2:, :m3]], axis=2)                     # (C,B,4,m1,m2,m3)
    M = 4 * m1 * m2 * m3
    xs = jnp.transpose(corners.reshape(C, B, M), (1, 0, 2))        # (B,C,M) tiny
    xr = jnp.real(xs).astype(jnp.float32)
    xi = jnp.imag(xs).astype(jnp.float32)

    out_r, out_i = pallas_mode_mix(xr, xi, wr_cdm, wi_cdm)         # (B, D, M)
    o = (out_r + 1j * out_i).astype(jnp.complex64)
    o4 = jnp.transpose(o, (1, 0, 2)).reshape(D, B, 4, m1, m2, m3)  # tiny transpose

    # Assemble out_ft by concatenation (no full-array dynamic-update-slice copies).
    zy = jnp.zeros((D, B, m1, Y - 2 * m2, m3), jnp.complex64)
    top = jnp.concatenate([o4[:, :, 0], zy, o4[:, :, 2]], axis=3)  # (D,B,m1,Y,m3)
    bot = jnp.concatenate([o4[:, :, 1], zy, o4[:, :, 3]], axis=3)
    zx = jnp.zeros((D, B, X - 2 * m1, Y, m3), jnp.complex64)
    full = jnp.concatenate([top, zx, bot], axis=2)                 # (D,B,X,Y,m3)
    zk = jnp.zeros((D, B, X, Y, Kz - m3), jnp.complex64)
    out_ft = jnp.concatenate([full, zk], axis=4)                   # (D,B,X,Y,Kz)

    y = jnp.fft.irfftn(out_ft, s=(X, Y, Z), axes=(2, 3, 4), norm="forward")
    return y.astype(jnp.float32).reshape(D, N)


# ----------------------------------------------------------------------------
# Full SimpleBlock3d forward (channels-first internally, bf16 residual stream)
# ----------------------------------------------------------------------------

def simple_block3d_forward(x, prep, m1, m2, m3):
    """x: (B, X, Y, Z, in_channels) -> (B, X, Y, Z, in_channels - 3)."""
    B, X, Y, Z, Cin = x.shape
    N = B * X * Y * Z

    # Single layout transpose to channels-first (C, N); N sits on lanes from here on.
    h = jnp.transpose(x, (4, 0, 1, 2, 3)).reshape(Cin, N).astype(jnp.bfloat16)

    # fc0: lift to `width` channels (bf16 residual stream).
    h = pallas_linear_cf(h, prep["fc0_w"], prep["fc0_b"], apply_relu=False)

    # 4 Fourier layers: x = relu( SpectralConv(x) + Conv1x1(x) )  (no relu on last)
    for layer in range(4):
        spec = spectral_conv3d_cf(h, prep["spec_wr"][layer], prep["spec_wi"][layer],
                                  B, X, Y, Z, m1, m2, m3)
        h = pallas_fused_wadd_cf(h, prep["w_w"][layer], prep["w_b"][layer], spec,
                                 apply_relu=(layer < 3))

    # fc1 + relu + fc2, fused in one pallas_call (hidden never leaves the kernel).
    out = pallas_fc_head(h, prep["fc1_w"], prep["fc1_b"], prep["fc2_w"], prep["fc2_b"])
    Cout = out.shape[0]
    return jnp.transpose(out.reshape(Cout, B, X, Y, Z), (1, 2, 3, 4, 0))


# ----------------------------------------------------------------------------
# Parameter init (natural layouts) + one-time preparation (kernel layouts)
# ----------------------------------------------------------------------------

def init_params(key, in_channels, width, m1, m2, m3, hidden=128):
    ks = jax.random.split(key, 32)
    it = iter(ks)
    scale = 1.0 / (width * width)
    return {
        # nn.Linear-style weights kept (in, out) here; repacked once in prepare_params.
        "fc0_w": 0.1 * jax.random.normal(next(it), (in_channels, width), jnp.float32),
        "fc0_b": 0.1 * jax.random.normal(next(it), (width,), jnp.float32),
        "fc1_w": 0.1 * jax.random.normal(next(it), (width, hidden), jnp.float32),
        "fc1_b": 0.1 * jax.random.normal(next(it), (hidden,), jnp.float32),
        "fc2_w": 0.1 * jax.random.normal(next(it), (hidden, in_channels - 3), jnp.float32),
        "fc2_b": 0.1 * jax.random.normal(next(it), (in_channels - 3,), jnp.float32),
        "w_w": [0.1 * jax.random.normal(next(it), (width, width), jnp.float32)
                for _ in range(4)],
        "w_b": [0.1 * jax.random.normal(next(it), (width,), jnp.float32)
                for _ in range(4)],
        # SpectralConv3d: 4 layers x 4 corner-weight tensors, complex split r/i.
        "spec_wr": [scale * jax.random.uniform(next(it), (4, width, width, m1, m2, m3),
                                               jnp.float32) for _ in range(4)],
        "spec_wi": [scale * jax.random.uniform(next(it), (4, width, width, m1, m2, m3),
                                               jnp.float32) for _ in range(4)],
    }


def prepare_params(raw):
    """Hoist every layout transpose / reshape / bf16 cast out of the forward path."""
    bf = jnp.bfloat16

    def spec_cdm(w):  # (4, Cin, Cout, m1, m2, m3) -> (Cin, Cout, 4*m1*m2*m3) bf16
        cin, cout = w.shape[1], w.shape[2]
        return jnp.transpose(w, (1, 2, 0, 3, 4, 5)).reshape(cin, cout, -1).astype(bf)

    return {
        "fc0_w": raw["fc0_w"].T.astype(bf), "fc0_b": raw["fc0_b"].reshape(-1, 1),
        "fc1_w": raw["fc1_w"].T.astype(bf), "fc1_b": raw["fc1_b"].reshape(-1, 1),
        "fc2_w": raw["fc2_w"].T.astype(bf), "fc2_b": raw["fc2_b"].reshape(-1, 1),
        "w_w": [w.T.astype(bf) for w in raw["w_w"]],
        "w_b": [b.reshape(-1, 1) for b in raw["w_b"]],
        "spec_wr": [spec_cdm(w) for w in raw["spec_wr"]],
        "spec_wi": [spec_cdm(w) for w in raw["spec_wi"]],
    }


# ----------------------------------------------------------------------------
# Pure-JAX f32 reference (for correctness checking; uses the raw/natural layouts)
# ----------------------------------------------------------------------------

def _spectral_ref(x, wr, wi, m1, m2, m3):
    B, X, Y, Z, C = x.shape
    w = (wr + 1j * wi).astype(jnp.complex64)  # (4, Cin, Cout, m1, m2, m3)
    x_ft = jnp.fft.rfftn(x, axes=(1, 2, 3), norm="forward")
    Kz = Z // 2 + 1
    out_ft = jnp.zeros((B, X, Y, Kz, C), jnp.complex64)
    mix = lambda xs, ws: jnp.einsum("axyzb,bdxyz->axyzd", xs, ws)
    out_ft = out_ft.at[:, :m1, :m2, :m3, :].set(mix(x_ft[:, :m1, :m2, :m3, :], w[0]))
    out_ft = out_ft.at[:, -m1:, :m2, :m3, :].set(mix(x_ft[:, -m1:, :m2, :m3, :], w[1]))
    out_ft = out_ft.at[:, :m1, -m2:, :m3, :].set(mix(x_ft[:, :m1, -m2:, :m3, :], w[2]))
    out_ft = out_ft.at[:, -m1:, -m2:, :m3, :].set(mix(x_ft[:, -m1:, -m2:, :m3, :], w[3]))
    return jnp.fft.irfftn(out_ft, s=(X, Y, Z), axes=(1, 2, 3),
                          norm="forward").astype(jnp.float32)


def reference_forward(x, params, m1, m2, m3):
    h = x @ params["fc0_w"] + params["fc0_b"]
    for layer in range(4):
        spec = _spectral_ref(h, params["spec_wr"][layer], params["spec_wi"][layer],
                             m1, m2, m3)
        h = spec + h @ params["w_w"][layer] + params["w_b"][layer]
        if layer < 3:
            h = jnp.maximum(h, 0.0)
    h = jnp.maximum(h @ params["fc1_w"] + params["fc1_b"], 0.0)
    return h @ params["fc2_w"] + params["fc2_b"]


# ----------------------------------------------------------------------------
# Main
# ----------------------------------------------------------------------------

if __name__ == "__main__":
    B, X, Y, Z = 2, 8, 8, 8          # N = B*X*Y*Z = 1024 -> two 512-wide lane tiles
    in_channels = 6
    width = 8
    m1 = m2 = m3 = 4                 # M = 4*m1*m2*m3 = 256 modes (lane-dense)

    key = jax.random.PRNGKey(0)
    k_x, k_p = jax.random.split(key)
    x = jax.random.normal(k_x, (B, X, Y, Z, in_channels), dtype=jnp.float32)
    raw_params = init_params(k_p, in_channels, width, m1, m2, m3)
    prep_params = prepare_params(raw_params)   # one-time layout plumbing + bf16 cast

    fwd = jax.jit(simple_block3d_forward, static_argnums=(2, 3, 4))
    out = jax.block_until_ready(fwd(x, prep_params, m1, m2, m3))
    assert out.shape == (B, X, Y, Z, in_channels - 3), out.shape

    ref = jax.block_until_ready(reference_forward(x, raw_params, m1, m2, m3))
    ref_scale = float(jnp.max(jnp.abs(ref)))
    max_err = float(jnp.max(jnp.abs(out - ref)))
    # bf16 activations/weights per the perf review -> relative tolerance vs f32 ref.
    tol = 5e-2 * max(ref_scale, 1.0)
    assert max_err < tol, f"mismatch vs reference: max abs err {max_err} (tol {tol})"

    print("KERNEL_OK")
</pallas_src>

<mosaic_0001>
module attributes {stable_mosaic.version = 11 : i64} {
  func.func @_linear_cf_kernel(%arg0: i32, %arg1: memref<6x512xbf16, #tpu.memory_space<vmem>>, %arg2: memref<8x6xbf16, #tpu.memory_space<vmem>>, %arg3: memref<8x1xf32, #tpu.memory_space<vmem>>, %arg4: memref<8x512xbf16, #tpu.memory_space<vmem>>) attributes {dimension_semantics = [#tpu.dimension_semantics<parallel>], iteration_bounds = array<i64: 2>, scalar_prefetch = 0 : i64, scratch_operands = 0 : i64, tpu.core_type = #tpu.core_type<tc>, window_params = [{transform_indices = @transform_0, window_bounds = array<i64: 6, 512>}, {pipeline_mode = #tpu.pipeline_mode<synchronous>, transform_indices = @transform_1, window_bounds = array<i64: 8, 6>}, {pipeline_mode = #tpu.pipeline_mode<synchronous>, transform_indices = @transform_2, window_bounds = array<i64: 8, 1>}, {transform_indices = @transform_3, window_bounds = array<i64: 8, 512>}]} {
    %c0 = arith.constant 0 : index
    %c0_0 = arith.constant 0 : index
    %0 = vector.load %arg1[%c0, %c0_0] : memref<6x512xbf16, #tpu.memory_space<vmem>>, vector<6x512xbf16>
    %1 = arith.extf %0 : vector<6x512xbf16> to vector<6x512xf32>
    %c0_1 = arith.constant 0 : index
    %c0_2 = arith.constant 0 : index
    %2 = vector.load %arg2[%c0_1, %c0_2] : memref<8x6xbf16, #tpu.memory_space<vmem>>, vector<8x6xbf16>
    %3 = arith.extf %2 : vector<8x6xbf16> to vector<8x6xf32>
    %cst = arith.constant 0.000000e+00 : f32
    %4 = vector.broadcast %cst : f32 to vector<8x512xf32>
    %5 = vector.extract_strided_slice %3 {offsets = [0, 0], sizes = [8, 1], strides = [1, 1]} : vector<8x6xf32> to vector<8x1xf32>
    %6 = vector.extract_strided_slice %1 {offsets = [0, 0], sizes = [1, 512], strides = [1, 1]} : vector<6x512xf32> to vector<1x512xf32>
    %7 = vector.broadcast %5 : vector<8x1xf32> to vector<8x512xf32>
    %8 = vector.broadcast %6 : vector<1x512xf32> to vector<8x512xf32>
    %9 = arith.mulf %7, %8 : vector<8x512xf32>
    %10 = arith.addf %4, %9 : vector<8x512xf32>
    %11 = vector.extract_strided_slice %3 {offsets = [0, 1], sizes = [8, 1], strides = [1, 1]} : vector<8x6xf32> to vector<8x1xf32>
    %12 = vector.extract_strided_slice %1 {offsets = [1, 0], sizes = [1, 512], strides = [1, 1]} : vector<6x512xf32> to vector<1x512xf32>
    %13 = vector.broadcast %11 : vector<8x1xf32> to vector<8x512xf32>
    %14 = vector.broadcast %12 : vector<1x512xf32> to vector<8x512xf32>
    %15 = arith.mulf %13, %14 : vector<8x512xf32>
    %16 = arith.addf %10, %15 : vector<8x512xf32>
    %17 = vector.extract_strided_slice %3 {offsets = [0, 2], sizes = [8, 1], strides = [1, 1]} : vector<8x6xf32> to vector<8x1xf32>
    %18 = vector.extract_strided_slice %1 {offsets = [2, 0], sizes = [1, 512], strides = [1, 1]} : vector<6x512xf32> to vector<1x512xf32>
    %19 = vector.broadcast %17 : vector<8x1xf32> to vector<8x512xf32>
    %20 = vector.broadcast %18 : vector<1x512xf32> to vector<8x512xf32>
    %21 = arith.mulf %19, %20 : vector<8x512xf32>
    %22 = arith.addf %16, %21 : vector<8x512xf32>
    %23 = vector.extract_strided_slice %3 {offsets = [0, 3], sizes = [8, 1], strides = [1, 1]} : vector<8x6xf32> to vector<8x1xf32>
    %24 = vector.extract_strided_slice %1 {offsets = [3, 0], sizes = [1, 512], strides = [1, 1]} : vector<6x512xf32> to vector<1x512xf32>
    %25 = vector.broadcast %23 : vector<8x1xf32> to vector<8x512xf32>
    %26 = vector.broadcast %24 : vector<1x512xf32> to vector<8x512xf32>
    %27 = arith.mulf %25, %26 : vector<8x512xf32>
    %28 = arith.addf %22, %27 : vector<8x512xf32>
    %29 = vector.extract_strided_slice %3 {offsets = [0, 4], sizes = [8, 1], strides = [1, 1]} : vector<8x6xf32> to vector<8x1xf32>
    %30 = vector.extract_strided_slice %1 {offsets = [4, 0], sizes = [1, 512], strides = [1, 1]} : vector<6x512xf32> to vector<1x512xf32>
    %31 = vector.broadcast %29 : vector<8x1xf32> to vector<8x512xf32>
    %32 = vector.broadcast %30 : vector<1x512xf32> to vector<8x512xf32>
    %33 = arith.mulf %31, %32 : vector<8x512xf32>
    %34 = arith.addf %28, %33 : vector<8x512xf32>
    %35 = vector.extract_strided_slice %3 {offsets = [0, 5], sizes = [8, 1], strides = [1, 1]} : vector<8x6xf32> to vector<8x1xf32>
    %36 = vector.extract_strided_slice %1 {offsets = [5, 0], sizes = [1, 512], strides = [1, 1]} : vector<6x512xf32> to vector<1x512xf32>
    %37 = vector.broadcast %35 : vector<8x1xf32> to vector<8x512xf32>
    %38 = vector.broadcast %36 : vector<1x512xf32> to vector<8x512xf32>
    %39 = arith.mulf %37, %38 : vector<8x512xf32>
    %40 = arith.addf %34, %39 : vector<8x512xf32>
    %c0_3 = arith.constant 0 : index
    %c0_4 = arith.constant 0 : index
    %41 = vector.load %arg3[%c0_3, %c0_4] : memref<8x1xf32, #tpu.memory_space<vmem>>, vector<8x1xf32>
    %42 = vector.broadcast %41 : vector<8x1xf32> to vector<8x512xf32>
    %43 = arith.addf %40, %42 : vector<8x512xf32>
    %44 = arith.truncf %43 : vector<8x512xf32> to vector<8x512xbf16>
    %c0_5 = arith.constant 0 : index
    %c0_6 = arith.constant 0 : index
    %45 = vector.load %arg4[%c0_5, %c0_6] : memref<8x512xbf16, #tpu.memory_space<vmem>>, vector<8x512xbf16>
    tpu.vector_store %arg4[%c0_5, %c0_6], %44 {strides = array<i32>} : memref<8x512xbf16, #tpu.memory_space<vmem>>, vector<8x512xbf16>,
    return
  }
  func.func @transform_0(%arg0: i32) -> (i32, i32) {
    %c0_i32 = arith.constant 0 : i32
    %c0_i32_0 = arith.constant 0 : i32
    return %c0_i32, %arg0 : i32, i32
  }
  func.func @transform_1(%arg0: i32) -> (i32, i32) {
    %c0_i32 = arith.constant 0 : i32
    %c0_i32_0 = arith.constant 0 : i32
    %c0_i32_1 = arith.constant 0 : i32
    return %c0_i32, %c0_i32_0 : i32, i32
  }
  func.func @transform_2(%arg0: i32) -> (i32, i32) {
    %c0_i32 = arith.constant 0 : i32
    %c0_i32_0 = arith.constant 0 : i32
    %c0_i32_1 = arith.constant 0 : i32
    return %c0_i32, %c0_i32_0 : i32, i32
  }
  func.func @transform_3(%arg0: i32) -> (i32, i32) {
    %c0_i32 = arith.constant 0 : i32
    %c0_i32_0 = arith.constant 0 : i32
    return %c0_i32, %arg0 : i32, i32
  }
}

module attributes {stable_mosaic.version = 11 : i64} {
  func.func @_mode_mix_kernel(%arg0: i32, %arg1: i32, %arg2: memref<1x8x256xf32, #tpu.memory_space<vmem>>, %arg3: memref<1x8x256xf32, #tpu.memory_space<vmem>>, %arg4: memref<8x8x256xbf16, #tpu.memory_space<vmem>>, %arg5: memref<8x8x256xbf16, #tpu.memory_space<vmem>>, %arg6: memref<1x8x256xf32, #tpu.memory_space<vmem>>, %arg7: memref<1x8x256xf32, #tpu.memory_space<vmem>>) attributes {dimension_semantics = [#tpu.dimension_semantics<parallel>, #tpu.dimension_semantics<parallel>], iteration_bounds = array<i64: 1, 2>, scalar_prefetch = 0 : i64, scratch_operands = 0 : i64, tpu.core_type = #tpu.core_type<tc>, window_params = [{transform_indices = @transform_0, window_bounds = array<i64: 1, 8, 256>}, {transform_indices = @transform_1, window_bounds = array<i64: 1, 8, 256>}, {transform_indices = @transform_2, window_bounds = array<i64: 8, 8, 256>}, {transform_indices = @transform_3, window_bounds = array<i64: 8, 8, 256>}, {transform_indices = @transform_4, window_bounds = array<i64: 1, 8, 256>}, {transform_indices = @transform_5, window_bounds = array<i64: 1, 8, 256>}]} {
    %cst = arith.constant 0.000000e+00 : f32
    %0 = vector.broadcast %cst : f32 to vector<8x256xf32>
    %cst_0 = arith.constant 0.000000e+00 : f32
    %1 = vector.broadcast %cst_0 : f32 to vector<8x256xf32>
    %c0 = arith.constant 0 : index
    %c0_1 = arith.constant 0 : index
    %c0_2 = arith.constant 0 : index
    %2 = vector.load %arg2[%c0, %c0_1, %c0_2] : memref<1x8x256xf32, #tpu.memory_space<vmem>>, vector<1x1x256xf32>
    %3 = vector.shape_cast %2 : vector<1x1x256xf32> to vector<1x256xf32>
    %c0_3 = arith.constant 0 : index
    %c0_4 = arith.constant 0 : index
    %c0_5 = arith.constant 0 : index
    %4 = vector.load %arg3[%c0_3, %c0_4, %c0_5] : memref<1x8x256xf32, #tpu.memory_space<vmem>>, vector<1x1x256xf32>
    %5 = vector.shape_cast %4 : vector<1x1x256xf32> to vector<1x256xf32>
    %c0_6 = arith.constant 0 : index
    %c0_7 = arith.constant 0 : index
    %c0_8 = arith.constant 0 : index
    %6 = vector.load %arg4[%c0_6, %c0_7, %c0_8] : memref<8x8x256xbf16, #tpu.memory_space<vmem>>, vector<1x8x256xbf16>
    %7 = vector.shape_cast %6 : vector<1x8x256xbf16> to vector<8x256xbf16>
    %8 = arith.extf %7 : vector<8x256xbf16> to vector<8x256xf32>
    %c0_9 = arith.constant 0 : index
    %c0_10 = arith.constant 0 : index
    %c0_11 = arith.constant 0 : index
    %9 = vector.load %arg5[%c0_9, %c0_10, %c0_11] : memref<8x8x256xbf16, #tpu.memory_space<vmem>>, vector<1x8x256xbf16>
    %10 = vector.shape_cast %9 : vector<1x8x256xbf16> to vector<8x256xbf16>
    %11 = arith.extf %10 : vector<8x256xbf16> to vector<8x256xf32>
    %12 = vector.broadcast %3 : vector<1x256xf32> to vector<8x256xf32>
    %13 = arith.mulf %8, %12 : vector<8x256xf32>
    %14 = arith.addf %0, %13 : vector<8x256xf32>
    %15 = vector.broadcast %5 : vector<1x256xf32> to vector<8x256xf32>
    %16 = arith.mulf %11, %15 : vector<8x256xf32>
    %17 = arith.subf %14, %16 : vector<8x256xf32>
    %18 = vector.broadcast %5 : vector<1x256xf32> to vector<8x256xf32>
    %19 = arith.mulf %8, %18 : vector<8x256xf32>
    %20 = arith.addf %1, %19 : vector<8x256xf32>
    %21 = vector.broadcast %3 : vector<1x256xf32> to vector<8x256xf32>
    %22 = arith.mulf %11, %21 : vector<8x256xf32>
    %23 = arith.addf %20, %22 : vector<8x256xf32>
    %c0_12 = arith.constant 0 : index
    %c1 = arith.constant 1 : index
    %c0_13 = arith.constant 0 : index
    %24 = vector.load %arg2[%c0_12, %c1, %c0_13] : memref<1x8x256xf32, #tpu.memory_space<vmem>>, vector<1x1x256xf32>
    %25 = vector.shape_cast %24 : vector<1x1x256xf32> to vector<1x256xf32>
    %c0_14 = arith.constant 0 : index
    %c1_15 = arith.constant 1 : index
    %c0_16 = arith.constant 0 : index
    %26 = vector.load %arg3[%c0_14, %c1_15, %c0_16] : memref<1x8x256xf32, #tpu.memory_space<vmem>>, vector<1x1x256xf32>
    %27 = vector.shape_cast %26 : vector<1x1x256xf32> to vector<1x256xf32>
    %c1_17 = arith.constant 1 : index
    %c0_18 = arith.constant 0 : index
    %c0_19 = arith.constant 0 : index
    %28 = vector.load %arg4[%c1_17, %c0_18, %c0_19] : memref<8x8x256xbf16, #tpu.memory_space<vmem>>, vector<1x8x256xbf16>
    %29 = vector.shape_cast %28 : vector<1x8x256xbf16> to vector<8x256xbf16>
    %30 = arith.extf %29 : vector<8x256xbf16> to vector<8x256xf32>
    %c1_20 = arith.constant 1 : index
    %c0_21 = arith.constant 0 : index
    %c0_22 = arith.constant 0 : index
    %31 = vector.load %arg5[%c1_20, %c0_21, %c0_22] : memref<8x8x256xbf16, #tpu.memory_space<vmem>>, vector<1x8x256xbf16>
    %32 = vector.shape_cast %31 : vector<1x8x256xbf16> to vector<8x256xbf16>
    %33 = arith.extf %32 : vector<8x256xbf16> to vector<8x256xf32>
    %34 = vector.broadcast %25 : vector<1x256xf32> to vector<8x256xf32>
    %35 = arith.mulf %30, %34 : vector<8x256xf32>
    %36 = arith.addf %17, %35 : vector<8x256xf32>
    %37 = vector.broadcast %27 : vector<1x256xf32> to vector<8x256xf32>
    %38 = arith.mulf %33, %37 : vector<8x256xf32>
    %39 = arith.subf %36, %38 : vector<8x256xf32>
    %40 = vector.broadcast %27 : vector<1x256xf32> to vector<8x256xf32>
    %41 = arith.mulf %30, %40 : vector<8x256xf32>
    %42 = arith.addf %23, %41 : vector<8x256xf32>
    %43 = vector.broadcast %25 : vector<1x256xf32> to vector<8x256xf32>
    %44 = arith.mulf %33, %43 : vector<8x256xf32>
    %45 = arith.addf %42, %44 : vector<8x256xf32>
    %c0_23 = arith.constant 0 : index
    %c2 = arith.constant 2 : index
    %c0_24 = arith.constant 0 : index
    %46 = vector.load %arg2[%c0_23, %c2, %c0_24] : memref<1x8x256xf32, #tpu.memory_space<vmem>>, vector<1x1x256xf32>
    %47 = vector.shape_cast %46 : vector<1x1x256xf32> to vector<1x256xf32>
    %c0_25 = arith.constant 0 : index
    %c2_26 = arith.constant 2 : index
    %c0_27 = arith.constant 0 : index
    %48 = vector.load %arg3[%c0_25, %c2_26, %c0_27] : memref<1x8x256xf32, #tpu.memory_space<vmem>>, vector<1x1x256xf32>
    %49 = vector.shape_cast %48 : vector<1x1x256xf32> to vector<1x256xf32>
    %c2_28 = arith.constant 2 : index
    %c0_29 = arith.constant 0 : index
    %c0_30 = arith.constant 0 : index
    %50 = vector.load %arg4[%c2_28, %c0_29, %c0_30] : memref<8x8x256xbf16, #tpu.memory_space<vmem>>, vector<1x8x256xbf16>
    %51 = vector.shape_cast %50 : vector<1x8x256xbf16> to vector<8x256xbf16>
    %52 = arith.extf %51 : vector<8x256xbf16> to vector<8x256xf32>
    %c2_31 = arith.constant 2 : index
    %c0_32 = arith.constant 0 : index
    %c0_33 = arith.constant 0 : index
    %53 = vector.load %arg5[%c2_31, %c0_32, %c0_33] : memref<8x8x256xbf16, #tpu.memory_space<vmem>>, vector<1x8x256xbf16>
    %54 = vector.shape_cast %53 : vector<1x8x256xbf16> to vector<8x256xbf16>
    %55 = arith.extf %54 : vector<8x256xbf16> to vector<8x256xf32>
    %56 = vector.broadcast %47 : vector<1x256xf32> to vector<8x256xf32>
    %57 = arith.mulf %52, %56 : vector<8x256xf32>
    %58 = arith.addf %39, %57 : vector<8x256xf32>
    %59 = vector.broadcast %49 : vector<1x256xf32> to vector<8x256xf32>
    %60 = arith.mulf %55, %59 : vector<8x256xf32>
    %61 = arith.subf %58, %60 : vector<8x256xf32>
    %62 = vector.broadcast %49 : vector<1x256xf32> to vector<8x256xf32>
    %63 = arith.mulf %52, %62 : vector<8x256xf32>
    %64 = arith.addf %45, %63 : vector<8x256xf32>
    %65 = vector.broadcast %47 : vector<1x256xf32> to vector<8x256xf32>
    %66 = arith.mulf %55, %65 : vector<8x256xf32>
    %67 = arith.addf %64, %66 : vector<8x256xf32>
    %c0_34 = arith.constant 0 : index
    %c3 = arith.constant 3 : index
    %c0_35 = arith.constant 0 : index
    %68 = vector.load %arg2[%c0_34, %c3, %c0_35] : memref<1x8x256xf32, #tpu.memory_space<vmem>>, vector<1x1x256xf32>
    %69 = vector.shape_cast %68 : vector<1x1x256xf32> to vector<1x256xf32>
    %c0_36 = arith.constant 0 : index
    %c3_37 = arith.constant 3 : index
    %c0_38 = arith.constant 0 : index
    %70 = vector.load %arg3[%c0_36, %c3_37, %c0_38] : memref<1x8x256xf32, #tpu.memory_space<vmem>>, vector<1x1x256xf32>
    %71 = vector.shape_cast %70 : vector<1x1x256xf32> to vector<1x256xf32>
    %c3_39 = arith.constant 3 : index
    %c0_40 = arith.constant 0 : index
    %c0_41 = arith.constant 0 : index
    %72 = vector.load %arg4[%c3_39, %c0_40, %c0_41] : memref<8x8x256xbf16, #tpu.memory_space<vmem>>, vector<1x8x256xbf16>
    %73 = vector.shape_cast %72 : vector<1x8x256xbf16> to vector<8x256xbf16>
    %74 = arith.extf %73 : vector<8x256xbf16> to vector<8x256xf32>
    %c3_42 = arith.constant 3 : index
    %c0_43 = arith.constant 0 : index
    %c0_44 = arith.constant 0 : index
    %75 = vector.load %arg5[%c3_42, %c0_43, %c0_44] : memref<8x8x256xbf16, #tpu.memory_space<vmem>>, vector<1x8x256xbf16>
    %76 = vector.shape_cast %75 : vector<1x8x256xbf16> to vector<8x256xbf16>
    %77 = arith.extf %76 : vector<8x256xbf16> to vector<8x256xf32>
    %78 = vector.broadcast %69 : vector<1x256xf32> to vector<8x256xf32>
    %79 = arith.mulf %74, %78 : vector<8x256xf32>
    %80 = arith.addf %61, %79 : vector<8x256xf32>
    %81 = vector.broadcast %71 : vector<1x256xf32> to vector<8x256xf32>
    %82 = arith.mulf %77, %81 : vector<8x256xf32>
    %83 = arith.subf %80, %82 : vector<8x256xf32>
    %84 = vector.broadcast %71 : vector<1x256xf32> to vector<8x256xf32>
    %85 = arith.mulf %74, %84 : vector<8x256xf32>
    %86 = arith.addf %67, %85 : vector<8x256xf32>
    %87 = vector.broadcast %69 : vector<1x256xf32> to vector<8x256xf32>
    %88 = arith.mulf %77, %87 : vector<8x256xf32>
    %89 = arith.addf %86, %88 : vector<8x256xf32>
    %c0_45 = arith.constant 0 : index
    %c4 = arith.constant 4 : index
    %c0_46 = arith.constant 0 : index
    %90 = vector.load %arg2[%c0_45, %c4, %c0_46] : memref<1x8x256xf32, #tpu.memory_space<vmem>>, vector<1x1x256xf32>
    %91 = vector.shape_cast %90 : vector<1x1x256xf32> to vector<1x256xf32>
    %c0_47 = arith.constant 0 : index
    %c4_48 = arith.constant 4 : index
    %c0_49 = arith.constant 0 : index
    %92 = vector.load %arg3[%c0_47, %c4_48, %c0_49] : memref<1x8x256xf32, #tpu.memory_space<vmem>>, vector<1x1x256xf32>
    %93 = vector.shape_cast %92 : vector<1x1x256xf32> to vector<1x256xf32>
    %c4_50 = arith.constant 4 : index
    %c0_51 = arith.constant 0 : index
    %c0_52 = arith.constant 0 : index
    %94 = vector.load %arg4[%c4_50, %c0_51, %c0_52] : memref<8x8x256xbf16, #tpu.memory_space<vmem>>, vector<1x8x256xbf16>
    %95 = vector.shape_cast %94 : vector<1x8x256xbf16> to vector<8x256xbf16>
    %96 = arith.extf %95 : vector<8x256xbf16> to vector<8x256xf32>
    %c4_53 = arith.constant 4 : index
    %c0_54 = arith.constant 0 : index
    %c0_55 = arith.constant 0 : index
    %97 = vector.load %arg5[%c4_53, %c0_54, %c0_55] : memref<8x8x256xbf16, #tpu.memory_space<vmem>>, vector<1x8x256xbf16>
    %98 = vector.shape_cast %97 : vector<1x8x256xbf16> to vector<8x256xbf16>
    %99 = arith.extf %98 : vector<8x256xbf16> to vector<8x256xf32>
    %100 = vector.broadcast %91 : vector<1x256xf32> to vector<8x256xf32>
    %101 = arith.mulf %96, %100 : vector<8x256xf32>
    %102 = arith.addf %83, %101 : vector<8x256xf32>
    %103 = vector.broadcast %93 : vector<1x256xf32> to vector<8x256xf32>
    %104 = arith.mulf %99, %103 : vector<8x256xf32>
    %105 = arith.subf %102, %104 : vector<8x256xf32>
    %106 = vector.broadcast %93 : vector<1x256xf32> to vector<8x256xf32>
    %107 = arith.mulf %96, %106 : vector<8x256xf32>
    %108 = arith.addf %89, %107 : vector<8x256xf32>
    %109 = vector.broadcast %91 : vector<1x256xf32> to vector<8x256xf32>
    %110 = arith.mulf %99, %109 : vector<8x256xf32>
    %111 = arith.addf %108, %110 : vector<8x256xf32>
    %c0_56 = arith.constant 0 : index
    %c5 = arith.constant 5 : index
    %c0_57 = arith.constant 0 : index
    %112 = vector.load %arg2[%c0_56, %c5, %c0_57] : memref<1x8x256xf32, #tpu.memory_space<vmem>>, vector<1x1x256xf32>
    %113 = vector.shape_cast %112 : vector<1x1x256xf32> to vector<1x256xf32>
    %c0_58 = arith.constant 0 : index
    %c5_59 = arith.constant 5 : index
    %c0_60 = arith.constant 0 : index
    %114 = vector.load %arg3[%c0_58, %c5_59, %c0_60] : memref<1x8x256xf32, #tpu.memory_space<vmem>>, vector<1x1x256xf32>
    %115 = vector.shape_cast %114 : vector<1x1x256xf32> to vector<1x256xf32>
    %c5_61 = arith.constant 5 : index
    %c0_62 = arith.constant 0 : index
    %c0_63 = arith.constant 0 : index
    %116 = vector.load %arg4[%c5_61, %c0_62, %c0_63] : memref<8x8x256xbf16, #tpu.memory_space<vmem>>, vector<1x8x256xbf16>
    %117 = vector.shape_cast %116 : vector<1x8x256xbf16> to vector<8x256xbf16>
    %118 = arith.extf %117 : vector<8x256xbf16> to vector<8x256xf32>
    %c5_64 = arith.constant 5 : index
    %c0_65 = arith.constant 0 : index
    %c0_66 = arith.constant 0 : index
    %119 = vector.load %arg5[%c5_64, %c0_65, %c0_66] : memref<8x8x256xbf16, #tpu.memory_space<vmem>>, vector<1x8x256xbf16>
    %120 = vector.shape_cast %119 : vector<1x8x256xbf16> to vector<8x256xbf16>
    %121 = arith.extf %120 : vector<8x256xbf16> to vector<8x256xf32>
    %122 = vector.broadcast %113 : vector<1x256xf32> to vector<8x256xf32>
    %123 = arith.mulf %118, %122 : vector<8x256xf32>
    %124 = arith.addf %105, %123 : vector<8x256xf32>
    %125 = vector.broadcast %115 : vector<1x256xf32> to vector<8x256xf32>
    %126 = arith.mulf %121, %125 : vector<8x256xf32>
    %127 = arith.subf %124, %126 : vector<8x256xf32>
    %128 = vector.broadcast %115 : vector<1x256xf32> to vector<8x256xf32>
    %129 = arith.mulf %118, %128 : vector<8x256xf32>
    %130 = arith.addf %111, %129 : vector<8x256xf32>
    %131 = vector.broadcast %113 : vector<1x256xf32> to vector<8x256xf32>
    %132 = arith.mulf %121, %131 : vector<8x256xf32>
    %133 = arith.addf %130, %132 : vector<8x256xf32>
    %c0_67 = arith.constant 0 : index
    %c6 = arith.constant 6 : index
    %c0_68 = arith.constant 0 : index
    %134 = vector.load %arg2[%c0_67, %c6, %c0_68] : memref<1x8x256xf32, #tpu.memory_space<vmem>>, vector<1x1x256xf32>
    %135 = vector.shape_cast %134 : vector<1x1x256xf32> to vector<1x256xf32>
    %c0_69 = arith.constant 0 : index
    %c6_70 = arith.constant 6 : index
    %c0_71 = arith.constant 0 : index
    %136 = vector.load %arg3[%c0_69, %c6_70, %c0_71] : memref<1x8x256xf32, #tpu.memory_space<vmem>>, vector<1x1x256xf32>
    %137 = vector.shape_cast %136 : vector<1x1x256xf32> to vector<1x256xf32>
    %c6_72 = arith.constant 6 : index
    %c0_73 = arith.constant 0 : index
    %c0_74 = arith.constant 0 : index
    %138 = vector.load %arg4[%c6_72, %c0_73, %c0_74] : memref<8x8x256xbf16, #tpu.memory_space<vmem>>, vector<1x8x256xbf16>
    %139 = vector.shape_cast %138 : vector<1x8x256xbf16> to vector<8x256xbf16>
    %140 = arith.extf %139 : vector<8x256xbf16> to vector<8x256xf32>
    %c6_75 = arith.constant 6 : index
    %c0_76 = arith.constant 0 : index
    %c0_77 = arith.constant 0 : index
    %141 = vector.load %arg5[%c6_75, %c0_76, %c0_77] : memref<8x8x256xbf16, #tpu.memory_space<vmem>>, vector<1x8x256xbf16>
    %142 = vector.shape_cast %141 : vector<1x8x256xbf16> to vector<8x256xbf16>
    %143 = arith.extf %142 : vector<8x256xbf16> to vector<8x256xf32>
    %144 = vector.broadcast %135 : vector<1x256xf32> to vector<8x256xf32>
    %145 = arith.mulf %140, %144 : vector<8x256xf32>
    %146 = arith.addf %127, %145 : vector<8x256xf32>
    %147 = vector.broadcast %137 : vector<1x256xf32> to vector<8x256xf32>
    %148 = arith.mulf %143, %147 : vector<8x256xf32>
    %149 = arith.subf %146, %148 : vector<8x256xf32>
    %150 = vector.broadcast %137 : vector<1x256xf32> to vector<8x256xf32>
    %151 = arith.mulf %140, %150 : vector<8x256xf32>
    %152 = arith.addf %133, %151 : vector<8x256xf32>
    %153 = vector.broadcast %135 : vector<1x256xf32> to vector<8x256xf32>
    %154 = arith.mulf %143, %153 : vector<8x256xf32>
    %155 = arith.addf %152, %154 : vector<8x256xf32>
    %c0_78 = arith.constant 0 : index
    %c7 = arith.constant 7 : index
    %c0_79 = arith.constant 0 : index
    %156 = vector.load %arg2[%c0_78, %c7, %c0_79] : memref<1x8x256xf32, #tpu.memory_space<vmem>>, vector<1x1x256xf32>
    %157 = vector.shape_cast %156 : vector<1x1x256xf32> to vector<1x256xf32>
    %c0_80 = arith.constant 0 : index
    %c7_81 = arith.constant 7 : index
    %c0_82 = arith.constant 0 : index
    %158 = vector.load %arg3[%c0_80, %c7_81, %c0_82] : memref<1x8x256xf32, #tpu.memory_space<vmem>>, vector<1x1x256xf32>
    %159 = vector.shape_cast %158 : vector<1x1x256xf32> to vector<1x256xf32>
    %c7_83 = arith.constant 7 : index
    %c0_84 = arith.constant 0 : index
    %c0_85 = arith.constant 0 : index
    %160 = vector.load %arg4[%c7_83, %c0_84, %c0_85] : memref<8x8x256xbf16, #tpu.memory_space<vmem>>, vector<1x8x256xbf16>
    %161 = vector.shape_cast %160 : vector<1x8x256xbf16> to vector<8x256xbf16>
    %162 = arith.extf %161 : vector<8x256xbf16> to vector<8x256xf32>
    %c7_86 = arith.constant 7 : index
    %c0_87 = arith.constant 0 : index
    %c0_88 = arith.constant 0 : index
    %163 = vector.load %arg5[%c7_86, %c0_87, %c0_88] : memref<8x8x256xbf16, #tpu.memory_space<vmem>>, vector<1x8x256xbf16>
    %164 = vector.shape_cast %163 : vector<1x8x256xbf16> to vector<8x256xbf16>
    %165 = arith.extf %164 : vector<8x256xbf16> to vector<8x256xf32>
    %166 = vector.broadcast %157 : vector<1x256xf32> to vector<8x256xf32>
    %167 = arith.mulf %162, %166 : vector<8x256xf32>
    %168 = arith.addf %149, %167 : vector<8x256xf32>
    %169 = vector.broadcast %159 : vector<1x256xf32> to vector<8x256xf32>
    %170 = arith.mulf %165, %169 : vector<8x256xf32>
    %171 = arith.subf %168, %170 : vector<8x256xf32>
    %172 = vector.broadcast %159 : vector<1x256xf32> to vector<8x256xf32>
    %173 = arith.mulf %162, %172 : vector<8x256xf32>
    %174 = arith.addf %155, %173 : vector<8x256xf32>
    %175 = vector.broadcast %157 : vector<1x256xf32> to vector<8x256xf32>
    %176 = arith.mulf %165, %175 : vector<8x256xf32>
    %177 = arith.addf %174, %176 : vector<8x256xf32>
    %c0_89 = arith.constant 0 : index
    %c0_90 = arith.constant 0 : index
    %c0_91 = arith.constant 0 : index
    %178 = vector.load %arg6[%c0_89, %c0_90, %c0_91] : memref<1x8x256xf32, #tpu.memory_space<vmem>>, vector<1x8x256xf32>
    %179 = vector.shape_cast %178 : vector<1x8x256xf32> to vector<8x256xf32>
    %180 = vector.shape_cast %171 : vector<8x256xf32> to vector<1x8x256xf32>
    tpu.vector_store %arg6[%c0_89, %c0_90, %c0_91], %180 {strides = array<i32>} : memref<1x8x256xf32, #tpu.memory_space<vmem>>, vector<1x8x256xf32>,
    %c0_92 = arith.constant 0 : index
    %c0_93 = arith.constant 0 : index
    %c0_94 = arith.constant 0 : index
    %181 = vector.load %arg7[%c0_92, %c0_93, %c0_94] : memref<1x8x256xf32, #tpu.memory_space<vmem>>, vector<1x8x256xf32>
    %182 = vector.shape_cast %181 : vector<1x8x256xf32> to vector<8x256xf32>
    %183 = vector.shape_cast %177 : vector<8x256xf32> to vector<1x8x256xf32>
    tpu.vector_store %arg7[%c0_92, %c0_93, %c0_94], %183 {strides = array<i32>} : memref<1x8x256xf32, #tpu.memory_space<vmem>>, vector<1x8x256xf32>,
    return
  }
  func.func @transform_0(%arg0: i32, %arg1: i32) -> (i32, i32, i32) {
    %c0_i32 = arith.constant 0 : i32
    %c0_i32_0 = arith.constant 0 : i32
    return %arg1, %c0_i32, %arg0 : i32, i32, i32
  }
  func.func @transform_1(%arg0: i32, %arg1: i32) -> (i32, i32, i32) {
    %c0_i32 = arith.constant 0 : i32
    %c0_i32_0 = arith.constant 0 : i32
    return %arg1, %c0_i32, %arg0 : i32, i32, i32
  }
  func.func @transform_2(%arg0: i32, %arg1: i32) -> (i32, i32, i32) {
    %c0_i32 = arith.constant 0 : i32
    %c0_i32_0 = arith.constant 0 : i32
    %c0_i32_1 = arith.constant 0 : i32
    return %c0_i32, %c0_i32_0, %arg0 : i32, i32, i32
  }
  func.func @transform_3(%arg0: i32, %arg1: i32) -> (i32, i32, i32) {
    %c0_i32 = arith.constant 0 : i32
    %c0_i32_0 = arith.constant 0 : i32
    %c0_i32_1 = arith.constant 0 : i32
    return %c0_i32, %c0_i32_0, %arg0 : i32, i32, i32
  }
  func.func @transform_4(%arg0: i32, %arg1: i32) -> (i32, i32, i32) {
    %c0_i32 = arith.constant 0 : i32
    %c0_i32_0 = arith.constant 0 : i32
    return %arg1, %c0_i32, %arg0 : i32, i32, i32
  }
  func.func @transform_5(%arg0: i32, %arg1: i32) -> (i32, i32, i32) {
    %c0_i32 = arith.constant 0 : i32
    %c0_i32_0 = arith.constant 0 : i32
    return %arg1, %c0_i32, %arg0 : i32, i32, i32
  }
}

module attributes {stable_mosaic.version = 11 : i64} {
  func.func @_fused_wadd_cf_kernel(%arg0: i32, %arg1: memref<8x512xbf16, #tpu.memory_space<vmem>>, %arg2: memref<8x8xbf16, #tpu.memory_space<vmem>>, %arg3: memref<8x1xf32, #tpu.memory_space<vmem>>, %arg4: memref<8x512xf32, #tpu.memory_space<vmem>>, %arg5: memref<8x512xbf16, #tpu.memory_space<vmem>>) attributes {dimension_semantics = [#tpu.dimension_semantics<parallel>], iteration_bounds = array<i64: 2>, scalar_prefetch = 0 : i64, scratch_operands = 0 : i64, tpu.core_type = #tpu.core_type<tc>, window_params = [{transform_indices = @transform_0, window_bounds = array<i64: 8, 512>}, {pipeline_mode = #tpu.pipeline_mode<synchronous>, transform_indices = @transform_1, window_bounds = array<i64: 8, 8>}, {pipeline_mode = #tpu.pipeline_mode<synchronous>, transform_indices = @transform_2, window_bounds = array<i64: 8, 1>}, {transform_indices = @transform_3, window_bounds = array<i64: 8, 512>}, {transform_indices = @transform_4, window_bounds = array<i64: 8, 512>}]} {
    %c0 = arith.constant 0 : index
    %c0_0 = arith.constant 0 : index
    %0 = vector.load %arg1[%c0, %c0_0] : memref<8x512xbf16, #tpu.memory_space<vmem>>, vector<8x512xbf16>
    %1 = arith.extf %0 : vector<8x512xbf16> to vector<8x512xf32>
    %c0_1 = arith.constant 0 : index
    %c0_2 = arith.constant 0 : index
    %2 = vector.load %arg2[%c0_1, %c0_2] : memref<8x8xbf16, #tpu.memory_space<vmem>>, vector<8x8xbf16>
    %3 = arith.extf %2 : vector<8x8xbf16> to vector<8x8xf32>
    %cst = arith.constant 0.000000e+00 : f32
    %4 = vector.broadcast %cst : f32 to vector<8x512xf32>
    %5 = vector.extract_strided_slice %3 {offsets = [0, 0], sizes = [8, 1], strides = [1, 1]} : vector<8x8xf32> to vector<8x1xf32>
    %6 = vector.extract_strided_slice %1 {offsets = [0, 0], sizes = [1, 512], strides = [1, 1]} : vector<8x512xf32> to vector<1x512xf32>
    %7 = vector.broadcast %5 : vector<8x1xf32> to vector<8x512xf32>
    %8 = vector.broadcast %6 : vector<1x512xf32> to vector<8x512xf32>
    %9 = arith.mulf %7, %8 : vector<8x512xf32>
    %10 = arith.addf %4, %9 : vector<8x512xf32>
    %11 = vector.extract_strided_slice %3 {offsets = [0, 1], sizes = [8, 1], strides = [1, 1]} : vector<8x8xf32> to vector<8x1xf32>
    %12 = vector.extract_strided_slice %1 {offsets = [1, 0], sizes = [1, 512], strides = [1, 1]} : vector<8x512xf32> to vector<1x512xf32>
    %13 = vector.broadcast %11 : vector<8x1xf32> to vector<8x512xf32>
    %14 = vector.broadcast %12 : vector<1x512xf32> to vector<8x512xf32>
    %15 = arith.mulf %13, %14 : vector<8x512xf32>
    %16 = arith.addf %10, %15 : vector<8x512xf32>
    %17 = vector.extract_strided_slice %3 {offsets = [0, 2], sizes = [8, 1], strides = [1, 1]} : vector<8x8xf32> to vector<8x1xf32>
    %18 = vector.extract_strided_slice %1 {offsets = [2, 0], sizes = [1, 512], strides = [1, 1]} : vector<8x512xf32> to vector<1x512xf32>
    %19 = vector.broadcast %17 : vector<8x1xf32> to vector<8x512xf32>
    %20 = vector.broadcast %18 : vector<1x512xf32> to vector<8x512xf32>
    %21 = arith.mulf %19, %20 : vector<8x512xf32>
    %22 = arith.addf %16, %21 : vector<8x512xf32>
    %23 = vector.extract_strided_slice %3 {offsets = [0, 3], sizes = [8, 1], strides = [1, 1]} : vector<8x8xf32> to vector<8x1xf32>
    %24 = vector.extract_strided_slice %1 {offsets = [3, 0], sizes = [1, 512], strides = [1, 1]} : vector<8x512xf32> to vector<1x512xf32>
    %25 = vector.broadcast %23 : vector<8x1xf32> to vector<8x512xf32>
    %26 = vector.broadcast %24 : vector<1x512xf32> to vector<8x512xf32>
    %27 = arith.mulf %25, %26 : vector<8x512xf32>
    %28 = arith.addf %22, %27 : vector<8x512xf32>
    %29 = vector.extract_strided_slice %3 {offsets = [0, 4], sizes = [8, 1], strides = [1, 1]} : vector<8x8xf32> to vector<8x1xf32>
    %30 = vector.extract_strided_slice %1 {offsets = [4, 0], sizes = [1, 512], strides = [1, 1]} : vector<8x512xf32> to vector<1x512xf32>
    %31 = vector.broadcast %29 : vector<8x1xf32> to vector<8x512xf32>
    %32 = vector.broadcast %30 : vector<1x512xf32> to vector<8x512xf32>
    %33 = arith.mulf %31, %32 : vector<8x512xf32>
    %34 = arith.addf %28, %33 : vector<8x512xf32>
    %35 = vector.extract_strided_slice %3 {offsets = [0, 5], sizes = [8, 1], strides = [1, 1]} : vector<8x8xf32> to vector<8x1xf32>
    %36 = vector.extract_strided_slice %1 {offsets = [5, 0], sizes = [1, 512], strides = [1, 1]} : vector<8x512xf32> to vector<1x512xf32>
    %37 = vector.broadcast %35 : vector<8x1xf32> to vector<8x512xf32>
    %38 = vector.broadcast %36 : vector<1x512xf32> to vector<8x512xf32>
    %39 = arith.mulf %37, %38 : vector<8x512xf32>
    %40 = arith.addf %34, %39 : vector<8x512xf32>
    %41 = vector.extract_strided_slice %3 {offsets = [0, 6], sizes = [8, 1], strides = [1, 1]} : vector<8x8xf32> to vector<8x1xf32>
    %42 = vector.extract_strided_slice %1 {offsets = [6, 0], sizes = [1, 512], strides = [1, 1]} : vector<8x512xf32> to vector<1x512xf32>
    %43 = vector.broadcast %41 : vector<8x1xf32> to vector<8x512xf32>
    %44 = vector.broadcast %42 : vector<1x512xf32> to vector<8x512xf32>
    %45 = arith.mulf %43, %44 : vector<8x512xf32>
    %46 = arith.addf %40, %45 : vector<8x512xf32>
    %47 = vector.extract_strided_slice %3 {offsets = [0, 7], sizes = [8, 1], strides = [1, 1]} : vector<8x8xf32> to vector<8x1xf32>
    %48 = vector.extract_strided_slice %1 {offsets = [7, 0], sizes = [1, 512], strides = [1, 1]} : vector<8x512xf32> to vector<1x512xf32>
    %49 = vector.broadcast %47 : vector<8x1xf32> to vector<8x512xf32>
    %50 = vector.broadcast %48 : vector<1x512xf32> to vector<8x512xf32>
    %51 = arith.mulf %49, %50 : vector<8x512xf32>
    %52 = arith.addf %46, %51 : vector<8x512xf32>
    %c0_3 = arith.constant 0 : index
    %c0_4 = arith.constant 0 : index
    %53 = vector.load %arg3[%c0_3, %c0_4] : memref<8x1xf32, #tpu.memory_space<vmem>>, vector<8x1xf32>
    %54 = vector.broadcast %53 : vector<8x1xf32> to vector<8x512xf32>
    %55 = arith.addf %52, %54 : vector<8x512xf32>
    %c0_5 = arith.constant 0 : index
    %c0_6 = arith.constant 0 : index
    %56 = vector.load %arg4[%c0_5, %c0_6] : memref<8x512xf32, #tpu.memory_space<vmem>>, vector<8x512xf32>
    %57 = arith.addf %55, %56 : vector<8x512xf32>
    %cst_7 = arith.constant 0.000000e+00 : f32
    %58 = vector.broadcast %cst_7 : f32 to vector<8x512xf32>
    %59 = arith.maximumf %57, %58 : vector<8x512xf32>
    %60 = arith.truncf %59 : vector<8x512xf32> to vector<8x512xbf16>
    %c0_8 = arith.constant 0 : index
    %c0_9 = arith.constant 0 : index
    %61 = vector.load %arg5[%c0_8, %c0_9] : memref<8x512xbf16, #tpu.memory_space<vmem>>, vector<8x512xbf16>
    tpu.vector_store %arg5[%c0_8, %c0_9], %60 {strides = array<i32>} : memref<8x512xbf16, #tpu.memory_space<vmem>>, vector<8x512xbf16>,
    return
  }
  func.func @transform_0(%arg0: i32) -> (i32, i32) {
    %c0_i32 = arith.constant 0 : i32
    %c0_i32_0 = arith.constant 0 : i32
    return %c0_i32, %arg0 : i32, i32
  }
  func.func @transform_1(%arg0: i32) -> (i32, i32) {
    %c0_i32 = arith.constant 0 : i32
    %c0_i32_0 = arith.constant 0 : i32
    %c0_i32_1 = arith.constant 0 : i32
    return %c0_i32, %c0_i32_0 : i32, i32
  }
  func.func @transform_2(%arg0: i32) -> (i32, i32) {
    %c0_i32 = arith.constant 0 : i32
    %c0_i32_0 = arith.constant 0 : i32
    %c0_i32_1 = arith.constant 0 : i32
    return %c0_i32, %c0_i32_0 : i32, i32
  }
  func.func @transform_3(%arg0: i32) -> (i32, i32) {
    %c0_i32 = arith.constant 0 : i32
    %c0_i32_0 = arith.constant 0 : i32
    return %c0_i32, %arg0 : i32, i32
  }
  func.func @transform_4(%arg0: i32) -> (i32, i32) {
    %c0_i32 = arith.constant 0 : i32
    %c0_i32_0 = arith.constant 0 : i32
    return %c0_i32, %arg0 : i32, i32
  }
}

module attributes {stable_mosaic.version = 11 : i64} {
  func.func @_fused_wadd_cf_kernel(%arg0: i32, %arg1: memref<8x512xbf16, #tpu.memory_space<vmem>>, %arg2: memref<8x8xbf16, #tpu.memory_space<vmem>>, %arg3: memref<8x1xf32, #tpu.memory_space<vmem>>, %arg4: memref<8x512xf32, #tpu.memory_space<vmem>>, %arg5: memref<8x512xbf16, #tpu.memory_space<vmem>>) attributes {dimension_semantics = [#tpu.dimension_semantics<parallel>], iteration_bounds = array<i64: 2>, scalar_prefetch = 0 : i64, scratch_operands = 0 : i64, tpu.core_type = #tpu.core_type<tc>, window_params = [{transform_indices = @transform_0, window_bounds = array<i64: 8, 512>}, {pipeline_mode = #tpu.pipeline_mode<synchronous>, transform_indices = @transform_1, window_bounds = array<i64: 8, 8>}, {pipeline_mode = #tpu.pipeline_mode<synchronous>, transform_indices = @transform_2, window_bounds = array<i64: 8, 1>}, {transform_indices = @transform_3, window_bounds = array<i64: 8, 512>}, {transform_indices = @transform_4, window_bounds = array<i64: 8, 512>}]} {
    %c0 = arith.constant 0 : index
    %c0_0 = arith.constant 0 : index
    %0 = vector.load %arg1[%c0, %c0_0] : memref<8x512xbf16, #tpu.memory_space<vmem>>, vector<8x512xbf16>
    %1 = arith.extf %0 : vector<8x512xbf16> to vector<8x512xf32>
    %c0_1 = arith.constant 0 : index
    %c0_2 = arith.constant 0 : index
    %2 = vector.load %arg2[%c0_1, %c0_2] : memref<8x8xbf16, #tpu.memory_space<vmem>>, vector<8x8xbf16>
    %3 = arith.extf %2 : vector<8x8xbf16> to vector<8x8xf32>
    %cst = arith.constant 0.000000e+00 : f32
    %4 = vector.broadcast %cst : f32 to vector<8x512xf32>
    %5 = vector.extract_strided_slice %3 {offsets = [0, 0], sizes = [8, 1], strides = [1, 1]} : vector<8x8xf32> to vector<8x1xf32>
    %6 = vector.extract_strided_slice %1 {offsets = [0, 0], sizes = [1, 512], strides = [1, 1]} : vector<8x512xf32> to vector<1x512xf32>
    %7 = vector.broadcast %5 : vector<8x1xf32> to vector<8x512xf32>
    %8 = vector.broadcast %6 : vector<1x512xf32> to vector<8x512xf32>
    %9 = arith.mulf %7, %8 : vector<8x512xf32>
    %10 = arith.addf %4, %9 : vector<8x512xf32>
    %11 = vector.extract_strided_slice %3 {offsets = [0, 1], sizes = [8, 1], strides = [1, 1]} : vector<8x8xf32> to vector<8x1xf32>
    %12 = vector.extract_strided_slice %1 {offsets = [1, 0], sizes = [1, 512], strides = [1, 1]} : vector<8x512xf32> to vector<1x512xf32>
    %13 = vector.broadcast %11 : vector<8x1xf32> to vector<8x512xf32>
    %14 = vector.broadcast %12 : vector<1x512xf32> to vector<8x512xf32>
    %15 = arith.mulf %13, %14 : vector<8x512xf32>
    %16 = arith.addf %10, %15 : vector<8x512xf32>
    %17 = vector.extract_strided_slice %3 {offsets = [0, 2], sizes = [8, 1], strides = [1, 1]} : vector<8x8xf32> to vector<8x1xf32>
    %18 = vector.extract_strided_slice %1 {offsets = [2, 0], sizes = [1, 512], strides = [1, 1]} : vector<8x512xf32> to vector<1x512xf32>
    %19 = vector.broadcast %17 : vector<8x1xf32> to vector<8x512xf32>
    %20 = vector.broadcast %18 : vector<1x512xf32> to vector<8x512xf32>
    %21 = arith.mulf %19, %20 : vector<8x512xf32>
    %22 = arith.addf %16, %21 : vector<8x512xf32>
    %23 = vector.extract_strided_slice %3 {offsets = [0, 3], sizes = [8, 1], strides = [1, 1]} : vector<8x8xf32> to vector<8x1xf32>
    %24 = vector.extract_strided_slice %1 {offsets = [3, 0], sizes = [1, 512], strides = [1, 1]} : vector<8x512xf32> to vector<1x512xf32>
    %25 = vector.broadcast %23 : vector<8x1xf32> to vector<8x512xf32>
    %26 = vector.broadcast %24 : vector<1x512xf32> to vector<8x512xf32>
    %27 = arith.mulf %25, %26 : vector<8x512xf32>
    %28 = arith.addf %22, %27 : vector<8x512xf32>
    %29 = vector.extract_strided_slice %3 {offsets = [0, 4], sizes = [8, 1], strides = [1, 1]} : vector<8x8xf32> to vector<8x1xf32>
    %30 = vector.extract_strided_slice %1 {offsets = [4, 0], sizes = [1, 512], strides = [1, 1]} : vector<8x512xf32> to vector<1x512xf32>
    %31 = vector.broadcast %29 : vector<8x1xf32> to vector<8x512xf32>
    %32 = vector.broadcast %30 : vector<1x512xf32> to vector<8x512xf32>
    %33 = arith.mulf %31, %32 : vector<8x512xf32>
    %34 = arith.addf %28, %33 : vector<8x512xf32>
    %35 = vector.extract_strided_slice %3 {offsets = [0, 5], sizes = [8, 1], strides = [1, 1]} : vector<8x8xf32> to vector<8x1xf32>
    %36 = vector.extract_strided_slice %1 {offsets = [5, 0], sizes = [1, 512], strides = [1, 1]} : vector<8x512xf32> to vector<1x512xf32>
    %37 = vector.broadcast %35 : vector<8x1xf32> to vector<8x512xf32>
    %38 = vector.broadcast %36 : vector<1x512xf32> to vector<8x512xf32>
    %39 = arith.mulf %37, %38 : vector<8x512xf32>
    %40 = arith.addf %34, %39 : vector<8x512xf32>
    %41 = vector.extract_strided_slice %3 {offsets = [0, 6], sizes = [8, 1], strides = [1, 1]} : vector<8x8xf32> to vector<8x1xf32>
    %42 = vector.extract_strided_slice %1 {offsets = [6, 0], sizes = [1, 512], strides = [1, 1]} : vector<8x512xf32> to vector<1x512xf32>
    %43 = vector.broadcast %41 : vector<8x1xf32> to vector<8x512xf32>
    %44 = vector.broadcast %42 : vector<1x512xf32> to vector<8x512xf32>
    %45 = arith.mulf %43, %44 : vector<8x512xf32>
    %46 = arith.addf %40, %45 : vector<8x512xf32>
    %47 = vector.extract_strided_slice %3 {offsets = [0, 7], sizes = [8, 1], strides = [1, 1]} : vector<8x8xf32> to vector<8x1xf32>
    %48 = vector.extract_strided_slice %1 {offsets = [7, 0], sizes = [1, 512], strides = [1, 1]} : vector<8x512xf32> to vector<1x512xf32>
    %49 = vector.broadcast %47 : vector<8x1xf32> to vector<8x512xf32>
    %50 = vector.broadcast %48 : vector<1x512xf32> to vector<8x512xf32>
    %51 = arith.mulf %49, %50 : vector<8x512xf32>
    %52 = arith.addf %46, %51 : vector<8x512xf32>
    %c0_3 = arith.constant 0 : index
    %c0_4 = arith.constant 0 : index
    %53 = vector.load %arg3[%c0_3, %c0_4] : memref<8x1xf32, #tpu.memory_space<vmem>>, vector<8x1xf32>
    %54 = vector.broadcast %53 : vector<8x1xf32> to vector<8x512xf32>
    %55 = arith.addf %52, %54 : vector<8x512xf32>
    %c0_5 = arith.constant 0 : index
    %c0_6 = arith.constant 0 : index
    %56 = vector.load %arg4[%c0_5, %c0_6] : memref<8x512xf32, #tpu.memory_space<vmem>>, vector<8x512xf32>
    %57 = arith.addf %55, %56 : vector<8x512xf32>
    %58 = arith.truncf %57 : vector<8x512xf32> to vector<8x512xbf16>
    %c0_7 = arith.constant 0 : index
    %c0_8 = arith.constant 0 : index
    %59 = vector.load %arg5[%c0_7, %c0_8] : memref<8x512xbf16, #tpu.memory_space<vmem>>, vector<8x512xbf16>
    tpu.vector_store %arg5[%c0_7, %c0_8], %58 {strides = array<i32>} : memref<8x512xbf16, #tpu.memory_space<vmem>>, vector<8x512xbf16>,
    return
  }
  func.func @transform_0(%arg0: i32) -> (i32, i32) {
    %c0_i32 = arith.constant 0 : i32
    %c0_i32_0 = arith.constant 0 : i32
    return %c0_i32, %arg0 : i32, i32
  }
  func.func @transform_1(%arg0: i32) -> (i32, i32) {
    %c0_i32 = arith.constant 0 : i32
    %c0_i32_0 = arith.constant 0 : i32
    %c0_i32_1 = arith.constant 0 : i32
    return %c0_i32, %c0_i32_0 : i32, i32
  }
  func.func @transform_2(%arg0: i32) -> (i32, i32) {
    %c0_i32 = arith.constant 0 : i32
    %c0_i32_0 = arith.constant 0 : i32
    %c0_i32_1 = arith.constant 0 : i32
    return %c0_i32, %c0_i32_0 : i32, i32
  }
  func.func @transform_3(%arg0: i32) -> (i32, i32) {
    %c0_i32 = arith.constant 0 : i32
    %c0_i32_0 = arith.constant 0 : i32
    return %c0_i32, %arg0 : i32, i32
  }
  func.func @transform_4(%arg0: i32) -> (i32, i32) {
    %c0_i32 = arith.constant 0 : i32
    %c0_i32_0 = arith.constant 0 : i32
    return %c0_i32, %arg0 : i32, i32
  }
}

module attributes {stable_mosaic.version = 11 : i64} {
  func.func @_fc_head_kernel(%arg0: i32, %arg1: memref<8x256xbf16, #tpu.memory_space<vmem>>, %arg2: memref<128x8xbf16, #tpu.memory_space<vmem>>, %arg3: memref<128x1xf32, #tpu.memory_space<vmem>>, %arg4: memref<3x128xbf16, #tpu.memory_space<vmem>>, %arg5: memref<3x1xf32, #tpu.memory_space<vmem>>, %arg6: memref<3x256xf32, #tpu.memory_space<vmem>>) attributes {dimension_semantics = [#tpu.dimension_semantics<parallel>], iteration_bounds = array<i64: 4>, scalar_prefetch = 0 : i64, scratch_operands = 0 : i64, tpu.core_type = #tpu.core_type<tc>, window_params = [{transform_indices = @transform_0, window_bounds = array<i64: 8, 256>}, {pipeline_mode = #tpu.pipeline_mode<synchronous>, transform_indices = @transform_1, window_bounds = array<i64: 128, 8>}, {pipeline_mode = #tpu.pipeline_mode<synchronous>, transform_indices = @transform_2, window_bounds = array<i64: 128, 1>}, {pipeline_mode = #tpu.pipeline_mode<synchronous>, transform_indices = @transform_3, window_bounds = array<i64: 3, 128>}, {pipeline_mode = #tpu.pipeline_mode<synchronous>, transform_indices = @transform_4, window_bounds = array<i64: 3, 1>}, {transform_indices = @transform_5, window_bounds = array<i64: 3, 256>}]} {
    %c0 = arith.constant 0 : index
    %c0_0 = arith.constant 0 : index
    %0 = vector.load %arg1[%c0, %c0_0] : memref<8x256xbf16, #tpu.memory_space<vmem>>, vector<8x256xbf16>
    %c0_1 = arith.constant 0 : index
    %c0_2 = arith.constant 0 : index
    %1 = vector.load %arg2[%c0_1, %c0_2] : memref<128x8xbf16, #tpu.memory_space<vmem>>, vector<128x8xbf16>
    %cst = arith.constant dense<0.000000e+00> : vector<128x256xf32>
    %2 = tpu.matmul %1, %0, %cst {dimension_numbers = #tpu.dot_dimension_numbers<[1], [0], [0], [1], [0, 0, 1, 1], [], []>} : vector<128x8xbf16>, vector<8x256xbf16>, vector<128x256xf32> -> vector<128x256xf32>
    %c0_3 = arith.constant 0 : index
    %c0_4 = arith.constant 0 : index
    %3 = vector.load %arg3[%c0_3, %c0_4] : memref<128x1xf32, #tpu.memory_space<vmem>>, vector<128x1xf32>
    %4 = vector.broadcast %3 : vector<128x1xf32> to vector<128x256xf32>
    %5 = arith.addf %2, %4 : vector<128x256xf32>
    %cst_5 = arith.constant 0.000000e+00 : f32
    %6 = vector.broadcast %cst_5 : f32 to vector<128x256xf32>
    %7 = arith.maximumf %5, %6 : vector<128x256xf32>
    %c0_6 = arith.constant 0 : index
    %c0_7 = arith.constant 0 : index
    %8 = vector.load %arg4[%c0_6, %c0_7] : memref<3x128xbf16, #tpu.memory_space<vmem>>, vector<3x128xbf16>
    %9 = arith.truncf %7 : vector<128x256xf32> to vector<128x256xbf16>
    %cst_8 = arith.constant dense<0.000000e+00> : vector<3x256xf32>
    %10 = tpu.matmul %8, %9, %cst_8 {dimension_numbers = #tpu.dot_dimension_numbers<[1], [0], [0], [1], [0, 0, 1, 1], [], []>} : vector<3x128xbf16>, vector<128x256xbf16>, vector<3x256xf32> -> vector<3x256xf32>
    %c0_9 = arith.constant 0 : index
    %c0_10 = arith.constant 0 : index
    %11 = vector.load %arg5[%c0_9, %c0_10] : memref<3x1xf32, #tpu.memory_space<vmem>>, vector<3x1xf32>
    %12 = vector.broadcast %11 : vector<3x1xf32> to vector<3x256xf32>
    %13 = arith.addf %10, %12 : vector<3x256xf32>
    %c0_11 = arith.constant 0 : index
    %c0_12 = arith.constant 0 : index
    %14 = vector.load %arg6[%c0_11, %c0_12] : memref<3x256xf32, #tpu.memory_space<vmem>>, vector<3x256xf32>
    tpu.vector_store %arg6[%c0_11, %c0_12], %13 {strides = array<i32>} : memref<3x256xf32, #tpu.memory_space<vmem>>, vector<3x256xf32>,
    return
  }
  func.func @transform_0(%arg0: i32) -> (i32, i32) {
    %c0_i32 = arith.constant 0 : i32
    %c0_i32_0 = arith.constant 0 : i32
    return %c0_i32, %arg0 : i32, i32
  }
  func.func @transform_1(%arg0: i32) -> (i32, i32) {
    %c0_i32 = arith.constant 0 : i32
    %c0_i32_0 = arith.constant 0 : i32
    %c0_i32_1 = arith.constant 0 : i32
    return %c0_i32, %c0_i32_0 : i32, i32
  }
  func.func @transform_2(%arg0: i32) -> (i32, i32) {
    %c0_i32 = arith.constant 0 : i32
    %c0_i32_0 = arith.constant 0 : i32
    %c0_i32_1 = arith.constant 0 : i32
    return %c0_i32, %c0_i32_0 : i32, i32
  }
  func.func @transform_3(%arg0: i32) -> (i32, i32) {
    %c0_i32 = arith.constant 0 : i32
    %c0_i32_0 = arith.constant 0 : i32
    %c0_i32_1 = arith.constant 0 : i32
    return %c0_i32, %c0_i32_0 : i32, i32
  }
  func.func @transform_4(%arg0: i32) -> (i32, i32) {
    %c0_i32 = arith.constant 0 : i32
    %c0_i32_0 = arith.constant 0 : i32
    %c0_i32_1 = arith.constant 0 : i32
    return %c0_i32, %c0_i32_0 : i32, i32
  }
  func.func @transform_5(%arg0: i32) -> (i32, i32) {
    %c0_i32 = arith.constant 0 : i32
    %c0_i32_0 = arith.constant 0 : i32
    return %c0_i32, %arg0 : i32, i32
  }
}

</mosaic_0001>

<bundles_post_ra>
// kernel: simple_block3d_forward.10
= control target key start
LH: loop header
LB: loop body
LE: loop exit
PB: predicated region body
PF: predicated region fallthrough
CT: control target
= control target key end

     0   :  { %s506_s12 = smov 0   ;;  %s568_s0 = inlined_call_operand.vmem [shape: bf16[6,1024], index: 0, kind: input, shape index: {}]   ;;  %s569_s1 = inlined_call_operand.vmem [shape: bf16[8,6], index: 1, kind: input, shape index: {}]   ;;  %s570_s2 = inlined_call_operand.vmem [shape: f32[8,1], index: 2, kind: input, shape index: {}]   ;;  %s571_s3 = inlined_call_operand.vmem [shape: bf16[8,1024], index: 3, kind: output, shape index: {}]  }
   0x1 LB: > { %s435_s13 = sadd.s32 4294967295, %s478_s12   ;;  %p439_p0 = scmp.ge.s32.totalorder %s478_s12, 1  ;;  %s478_s12 = sphi %s506_s12, %s13_s12  }
   0x2   : > { %p138_p1 = scmp.lt.s32.totalorder %s478_s12, 3 }
   0x4   : > { %p139_p2 = pnand %p439_p0, %p138_p1 }
   0x5   : > { %v180_v0 = vld [vmem:[%s569_s1] sm:$0xf] (!%p139_p2)  ;;  %v480_v1 = vmov (!%p139_p2), 0   ;;  %v481_v2 = vmov (!%p139_p2), 2   ;;  %v482_v4 = vmov (!%p139_p2), 1   ;;  %v483_v5 = vmov (!%p139_p2), 3  }
   0x6   : > { %142 = sbr.rel (%p139_p2) target bundleno = 158 (0x9e), region = 32  ;;  %464 = vset.pattern.permute.xlu0 (!%p139_p2), %v480_v1  ;;  %466 = vset.pattern.permute.xlu1 (!%p139_p2), %v481_v2  ;;  %v181_v3 = vunpack.c.l.bf16 (!%p139_p2), %v180_v0  ;;  %v484_v6 = vmov (!%p139_p2), 4   ;;  %v485_v7 = vmov (!%p139_p2), 5   ;;  %v351_v8 = vld [vmem:[%s570_s2] sm:$0xff] (!%p139_p2)  ;;  %s440_s18 = sshll.u32 (!%p139_p2), %s435_s13, 2  ;;  %v187_v9 = vlaneseq (!%p139_p2) }
   0x7   : > { %p163_p3 = scmp.lt.s32.totalorder (!%p139_p2), %s440_s18, 7 }
   0x8   : > { %184 = vperm.xlu0 (!%p139_p2), %464, %v181_v3   ;;  %240 = vperm.xlu1 (!%p139_p2), %466, %v181_v3   ;;  %v188_v10 = vshrl.u32 (!%p139_p2), %v187_v9, 7 }
   0xa   : > { %v189_v13 = vsub.s32 (!%p139_p2), 0, %v188_v10  ;;  %v245_v18 = vsub.s32 (!%p139_p2), 2, %v188_v10  ;;  %v217_v19 = vsub.s32 (!%p139_p2), 1, %v188_v10  ;;  %v273_v21 = vsub.s32 (!%p139_p2), 3, %v188_v10 }
   0xb   : > { %v301_v22 = vsub.s32 (!%p139_p2), 4, %v188_v10  ;;  %v329_v32 = vsub.s32 (!%p139_p2), 5, %v188_v10 }
   0xc   : > { %465 = vset.pattern.permute.xlu0 (!%p139_p2), %v482_v4  ;;  %467 = vset.pattern.permute.xlu1 (!%p139_p2), %v483_v5 }
   0xd   : > { %212 = vperm.xlu0 %465, %v181_v3   ;;  %268 = vperm.xlu1 %467, %v181_v3   ;;  %s573_s18 = smov (!%p163_p3, %s440_s18), 7 }
   0xe   : > { %s441_s19 = sshll.u32 %s573_s18, 2 }
   0xf   : > { %s166_s22 = scalar_lea.vmem %s568_s0, %s441_s19  ;;  %s172_s25 = scalar_lea.vmem %s571_s3, %s441_s19 }
  0x10   : > { %v174_v11 = vld [vmem:[%s166_s22] sm:$0x77]  ;;  %v175_v12 = vld [vmem:[%s166_s22 + $0x8] sm:$0x77] }
  0x11   : > { %468 = vset.pattern.permute.xlu1 %v484_v6  ;;  %469 = vset.pattern.permute.xlu0 %v485_v7  ;;  %v528_v14 = vunpack.c.l.bf16 %v174_v11  ;;  %v530_v15 = vunpack.c.h.bf16 %v174_v11  ;;  %v532_v16 = vunpack.c.l.bf16 %v175_v12  ;;  %v534_v17 = vunpack.c.h.bf16 %v175_v12 }
  0x12   : > { %296 = vperm.xlu1 %468, %v181_v3   ;;  %324 = vperm.xlu0 %469, %v181_v3  }
  0x13   : > { %v190_v20 = vrot.slane %v528_v14, %v189_v13  ;;  %v194_v23 = vrot.slane %v530_v15, %v189_v13  ;;  %v198_v24 = vrot.slane %v532_v16, %v189_v13  ;;  %v202_v25 = vrot.slane %v534_v17, %v189_v13 }
  0x14   : > { %v246_v26 = vrot.slane %v528_v14, %v245_v18  ;;  %v250_v29 = vrot.slane %v530_v15, %v245_v18  ;;  %v254_v30 = vrot.slane %v532_v16, %v245_v18  ;;  %v258_v31 = vrot.slane %v534_v17, %v245_v18 }
  0x15   : > { %v218_v33 = vrot.slane %v528_v14, %v217_v19  ;;  %v222_v34 = vrot.slane %v530_v15, %v217_v19  ;;  %v226_v35 = vrot.slane %v532_v16, %v217_v19  ;;  %v230_v36 = vrot.slane %v534_v17, %v217_v19 }
  0x16   : > { %470 = vset.pattern.permute.xlu1 %v480_v1  ;;  %471 = vset.pattern.permute.xlu0 %v480_v1  ;;  %v274_v37 = vrot.slane %v528_v14, %v273_v21  ;;  %v278_v38 = vrot.slane %v530_v15, %v273_v21  ;;  %v282_v39 = vrot.slane %v532_v16, %v273_v21 }
  0x17   : > { %354 = vperm.xlu1 %470, %v351_v8   ;;  %v286_v40 = vrot.slane %v534_v17, %v273_v21  ;;  %v302_v41 = vrot.slane %v528_v14, %v301_v22  ;;  %v306_v42 = vrot.slane %v530_v15, %v301_v22  ;;  %v310_v43 = vrot.slane %v532_v16, %v301_v22 }
  0x18   : > { %v314_v44 = vrot.slane %v534_v17, %v301_v22  ;;  %v330_v45 = vrot.slane %v528_v14, %v329_v32  ;;  %v334_v46 = vrot.slane %v530_v15, %v329_v32  ;;  %v338_v47 = vrot.slane %v532_v16, %v329_v32 }
  0x19   : > { %v342_v48 = vrot.slane %v534_v17, %v329_v32 }
  0x87   : > { %v185_v27 = vpop.permute.xlu0 %184  ;;  %v241_v28 = vpop.permute.xlu1 %240 }
  0x88   : > { %v203_v49 = vmul.f32 %v190_v20, %v185_v27  ;;  %v204_v50 = vmul.f32 %v194_v23, %v185_v27  ;;  %v205_v51 = vmul.f32 %v198_v24, %v185_v27  ;;  %v206_v52 = vmul.f32 %v202_v25, %v185_v27 }
  0x89   : > { %v259_v59 = vmul.f32 %v246_v26, %v241_v28  ;;  %v260_v60 = vmul.f32 %v250_v29, %v241_v28  ;;  %v261_v61 = vmul.f32 %v254_v30, %v241_v28  ;;  %v262_v62 = vmul.f32 %v258_v31, %v241_v28 }
  0x8c   : > { %v213_v53 = vpop.permute.xlu0 %212  ;;  %v269_v54 = vpop.permute.xlu1 %268 }
  0x8d   : > { %v231_v55 = vmul.f32 %v218_v33, %v213_v53  ;;  %v232_v56 = vmul.f32 %v222_v34, %v213_v53  ;;  %v233_v57 = vmul.f32 %v226_v35, %v213_v53  ;;  %v234_v58 = vmul.f32 %v230_v36, %v213_v53 }
  0x8e   : > { %v287_v3 = vmul.f32 %v274_v37, %v269_v54  ;;  %v288_v4 = vmul.f32 %v278_v38, %v269_v54  ;;  %v289_v5 = vmul.f32 %v282_v39, %v269_v54  ;;  %v290_v6 = vmul.f32 %v286_v40, %v269_v54 }
  0x8f   : > { %v235_v63 = vadd.f32 %v231_v55, %v203_v49  ;;  %v236_v0 = vadd.f32 %v232_v56, %v204_v50  ;;  %v237_v1 = vadd.f32 %v233_v57, %v205_v51  ;;  %v238_v2 = vadd.f32 %v234_v58, %v206_v52 }
  0x91   : > { %v263_v7 = vadd.f32 %v259_v59, %v235_v63  ;;  %v264_v8 = vadd.f32 %v260_v60, %v236_v0  ;;  %v265_v9 = vadd.f32 %v261_v61, %v237_v1  ;;  %v266_v10 = vadd.f32 %v262_v62, %v238_v2  ;;  %v297_v11 = vpop.permute.xlu1 %296  ;;  %v325_v12 = vpop.permute.xlu0 %324 }
  0x92   : > { %v315_v13 = vmul.f32 %v302_v41, %v297_v11  ;;  %v316_v14 = vmul.f32 %v306_v42, %v297_v11  ;;  %v317_v15 = vmul.f32 %v310_v43, %v297_v11  ;;  %v318_v16 = vmul.f32 %v314_v44, %v297_v11 }
  0x93   : > { %v291_v17 = vadd.f32 %v287_v3, %v263_v7  ;;  %v292_v18 = vadd.f32 %v288_v4, %v264_v8  ;;  %v293_v19 = vadd.f32 %v289_v5, %v265_v9  ;;  %v294_v20 = vadd.f32 %v290_v6, %v266_v10 }
  0x94   : > { %v343_v21 = vmul.f32 %v330_v45, %v325_v12  ;;  %v344_v22 = vmul.f32 %v334_v46, %v325_v12  ;;  %v345_v23 = vmul.f32 %v338_v47, %v325_v12  ;;  %v346_v24 = vmul.f32 %v342_v48, %v325_v12 }
  0x95   : > { %v319_v25 = vadd.f32 %v315_v13, %v291_v17  ;;  %v320_v26 = vadd.f32 %v316_v14, %v292_v18  ;;  %v321_v27 = vadd.f32 %v317_v15, %v293_v19  ;;  %v322_v28 = vadd.f32 %v318_v16, %v294_v20 }
  0x96   : > { %v355_v29 = vpop.permute.xlu1 %354 }
  0x97   : > { %v347_v30 = vadd.f32 %v343_v21, %v319_v25  ;;  %v348_v31 = vadd.f32 %v344_v22, %v320_v26  ;;  %v349_v32 = vadd.f32 %v345_v23, %v321_v27  ;;  %v350_v33 = vadd.f32 %v346_v24, %v322_v28 }
  0x99   : > { %v357_v34 = vadd.f32 %v355_v29, %v347_v30  ;;  %v358_v35 = vadd.f32 %v355_v29, %v348_v31  ;;  %v359_v36 = vadd.f32 %v355_v29, %v349_v32  ;;  %v360_v37 = vadd.f32 %v355_v29, %v350_v33 }
  0x9b   : > { %v448_v38 = vpack.c.bf16 %v358_v35, %v357_v34  ;;  %v449_v39 = vpack.c.bf16 %v360_v37, %v359_v36 }
  0x9d   : > { %377 = vst [vmem:[%s172_s25] sm:$0xff] %v448_v38  ;;  %378 = vst [vmem:[%s172_s25 + $0x8] sm:$0xff] %v449_v39 }
  0x9e PF: > { %s13_s12 = sadd.s32 1, %s478_s12  }
  0x9f   : > { %p10_p4 = scmp.ge.s32.totalorder %s13_s12, 4  }
  0xa1   :  { %12 = sbr.rel (!%p10_p4) target bundleno = 1 (0x1), region = 62 }

// kernel: simple_block3d_forward.11
= control target key start
LH: loop header
LB: loop body
LE: loop exit
PB: predicated region body
PF: predicated region fallthrough
CT: control target
= control target key end

     0   :  { %s1080_s18 = smov 0   ;;  %s1082_s19 = smov 0   ;;  %s1516_s0 = inlined_call_operand.vmem [shape: f32[2,8,256], index: 0, kind: input, shape index: {}]   ;;  %s1517_s1 = inlined_call_operand.vmem [shape: f32[2,8,256], index: 1, kind: input, shape index: {}]   ;;  %s1518_s2 = inlined_call_operand.vmem [shape: bf16[8,8,256], index: 2, kind: input, shape index: {}]   ;;  %s1519_s3 = inlined_call_operand.vmem [shape: bf16[8,8,256], index: 3, kind: input, shape index: {}]   ;;  %s1520_s4 = inlined_call_operand.vmem [shape: f32[2,8,256], index: 4, kind: output, shape index: {0}]   ;;  %s1521_s5 = inlined_call_operand.vmem [shape: f32[2,8,256], index: 5, kind: output, shape index: {1}]  }
   0x1   :  { %s1084_s20 = smov 0  }
   0x2 LB: > { %s25_s21 = sadd.s32 1, %s1044_s19  ;;  %p959_p0 = scmp.ge.s32.totalorder %s1048_s20, 1  ;;  %s1048_s20 = sphi %s1084_s20, %s16_s20   ;;  %s1044_s19 = sphi %s1082_s19, %s1569_s19   ;;  %s1040_s18 = sphi %s1080_s18, %s1568_s18  }
   0x3   : > { %p26_p1 = scmp.ge.s32.totalorder %s25_s21, 2  ;;  %p252_p2 = scmp.lt.s32.totalorder %s1048_s20, 3 }
   0x5   : > { %s1571_s21 = smov (%p26_p1, %s25_s21), 0  ;;  %p253_p3 = pnand %p959_p0, %p252_p2 }
   0x6   : > { %p317_p4 = scmp.lt.s32.totalorder (!%p253_p3), %s1040_s18, 1  ;;  %v377_v0 = vlaneseq (!%p253_p3)  ;;  %v1101_v1 = vld [vmem:[%s1518_s2] sm:$0xff] (!%p253_p3)  ;;  %v1111_v4 = vld [vmem:[%s1518_s2 + $0x8] sm:$0xff] (!%p253_p3)  ;;  %v1121_v6 = vld [vmem:[%s1518_s2 + $0x10] sm:$0xff] (!%p253_p3) }
   0x7   : > { %256 = sbr.rel (%p253_p3) target bundleno = 79 (0x4f), region = 36  ;;  %v1106_v2 = vld [vmem:[%s1519_s3] sm:$0xff] (!%p253_p3)  ;;  %v1116_v5 = vld [vmem:[%s1519_s3 + $0x8] sm:$0xff] (!%p253_p3)  ;;  %v1126_v7 = vld [vmem:[%s1519_s3 + $0x10] sm:$0xff] (!%p253_p3)  ;;  %v371_v12 = vunpack.c.l.bf16 (!%p253_p3), %v1101_v1  ;;  %v372_v13 = vunpack.c.h.bf16 (!%p253_p3), %v1101_v1  ;;  %v420_v22 = vunpack.c.l.bf16 (!%p253_p3), %v1111_v4  ;;  %v421_v23 = vunpack.c.h.bf16 (!%p253_p3), %v1111_v4 }
   0x8   : > { %v378_v3 = vshrl.u32 (!%p253_p3), %v377_v0, 7  ;;  %v1135_v9 = vld [vmem:[%s1518_s2 + $0x18] sm:$0xff] (!%p253_p3)  ;;  %v1145_v11 = vld [vmem:[%s1518_s2 + $0x20] sm:$0xff] (!%p253_p3)  ;;  %v374_v14 = vunpack.c.l.bf16 (!%p253_p3), %v1106_v2  ;;  %v1172_v17 = vld [vmem:[%s1518_s2 + $0x28] sm:$0xff] (!%p253_p3)  ;;  %v375_v21 = vunpack.c.h.bf16 (!%p253_p3), %v1106_v2  ;;  %v1533_v24 = vunpack.c.l.bf16 (!%p253_p3), %v1116_v5 }
   0x9   : > { %v1140_v10 = vld [vmem:[%s1519_s3 + $0x18] sm:$0xff] (!%p253_p3)  ;;  %v1167_v16 = vld [vmem:[%s1519_s3 + $0x20] sm:$0xff] (!%p253_p3)  ;;  %v1177_v18 = vld [vmem:[%s1519_s3 + $0x28] sm:$0xff] (!%p253_p3)  ;;  %v1522_v29 = vunpack.c.l.bf16 (!%p253_p3), %v1121_v6  ;;  %v1524_v30 = vunpack.c.l.bf16 (!%p253_p3), %v1126_v7  ;;  %v1523_v32 = vunpack.c.l.bf16 (!%p253_p3), %v1135_v9  ;;  %v1526_v34 = vunpack.c.l.bf16 (!%p253_p3), %v1145_v11 }
   0xa   : > { %v1130_v8 = vsub.s32 (!%p253_p3), 0, %v378_v3  ;;  %v1162_v15 = vsub.s32 (!%p253_p3), 1, %v378_v3  ;;  %v1531_v33 = vunpack.c.l.bf16 (!%p253_p3), %v1140_v10  ;;  %v1200_v35 = vld [vmem:[%s1518_s2 + $0x30] sm:$0xff] (!%p253_p3)  ;;  %v1527_v41 = vunpack.c.l.bf16 (!%p253_p3), %v1167_v16  ;;  %v1215_v42 = vld [vmem:[%s1518_s2 + $0x38] sm:$0xff] (!%p253_p3) }
   0xb   : > { %v1205_v36 = vld [vmem:[%s1519_s3 + $0x30] sm:$0xff] (!%p253_p3)  ;;  %v1220_v43 = vld [vmem:[%s1519_s3 + $0x38] sm:$0xff] (!%p253_p3)  ;;  %v1530_v48 = vunpack.c.l.bf16 (!%p253_p3), %v1172_v17  ;;  %v1536_v49 = vunpack.c.l.bf16 (!%p253_p3), %v1177_v18  ;;  %v1537_v53 = vunpack.c.l.bf16 (!%p253_p3), %v1200_v35 }
   0xc   : > { %v1538_v56 = vunpack.c.l.bf16 (!%p253_p3), %v1205_v36 }
   0xe   : > { %s1573_s18 = smov (!%p317_p4, %s1040_s18), 1 }
   0xf   : > { %s1128_s9 = sshll.u32 %s1573_s18, 4 }
  0x10   : > { %s1151_s18 = scalar_lea.vmem %s1516_s0, %s1128_s9  ;;  %s1157_s24 = scalar_lea.vmem %s1517_s1, %s1128_s9 }
  0x11   : > { %v368_v19 = vld [vmem:[%s1151_s18] ss:$8 sm:$0x3]  ;;  %v968_v27 = vld [vmem:[%s1151_s18 + $0x1] ss:$8 sm:$0x3]  ;;  %s1433_s17 = scalar_lea.vmem %s1520_s4, %s1128_s9  ;;  %s366_s23 = scalar_lea.vmem %s1521_s5, %s1128_s9 }
  0x12   : > { %v369_v20 = vld [vmem:[%s1157_s24] ss:$8 sm:$0x3]  ;;  %v380_v25 = vrot.slane %v368_v19, %v1130_v8  ;;  %v969_v28 = vld [vmem:[%s1157_s24 + $0x1] ss:$8 sm:$0x3]  ;;  %v1192_v31 = vrot.slane %v968_v27, %v1130_v8  ;;  %v384_v44 = vrot.slane %v368_v19, %v1162_v15  ;;  %v1235_v54 = vrot.slane %v968_v27, %v1162_v15 }
  0x13   : > { %v395_v26 = vrot.slane %v369_v20, %v1130_v8  ;;  %v445_v39 = vrot.slane %v969_v28, %v1130_v8  ;;  %v972_v40 = vld [vmem:[%s1151_s18 + $0x2] ss:$8 sm:$0x3]  ;;  %v399_v45 = vrot.slane %v369_v20, %v1162_v15  ;;  %v976_v47 = vld [vmem:[%s1151_s18 + $0x3] ss:$8 sm:$0x3]  ;;  %v1532_v19 = vunpack.c.h.bf16 %v1116_v5 }
  0x14   : > { %v387_v37 = vmul.f32 %v380_v25, %v371_v12  ;;  %v973_v46 = vld [vmem:[%s1157_s24 + $0x2] ss:$8 sm:$0x3]  ;;  %v437_v51 = vmul.f32 %v1192_v31, %v420_v22  ;;  %v1238_v55 = vrot.slane %v972_v40, %v1130_v8  ;;  %v1246_v60 = vrot.slane %v976_v47, %v1130_v8  ;;  %v977_v1 = vld [vmem:[%s1157_s24 + $0x3] ss:$8 sm:$0x3] }
  0x15   : > { %v402_v38 = vmul.f32 %v395_v26, %v374_v14  ;;  %v452_v52 = vmul.f32 %v445_v39, %v1533_v24  ;;  %v1243_v59 = vrot.slane %v973_v46, %v1130_v8  ;;  %v388_v62 = vmul.f32 %v384_v44, %v372_v13  ;;  %v980_v3 = vld [vmem:[%s1151_s18 + $0x4] ss:$8 sm:$0x3] }
  0x16   : > { %v403_v63 = vmul.f32 %v399_v45, %v375_v21  ;;  %v487_v0 = vmul.f32 %v1238_v55, %v1522_v29  ;;  %v449_v20 = vrot.slane %v969_v28, %v1162_v15  ;;  %v438_v29 = vmul.f32 %v1235_v54, %v421_v23  ;;  %v981_v57 = vld [vmem:[%s1157_s24 + $0x4] ss:$8 sm:$0x3] }
  0x17   : > { %v404_v50 = vsub.f32 %v387_v37, %v402_v38  ;;  %v502_v37 = vmul.f32 %v1243_v59, %v1524_v30  ;;  %v1525_v38 = vunpack.c.h.bf16 %v1121_v6  ;;  %v1268_v61 = vrot.slane %v972_v40, %v1162_v15 }
  0x18   : > { %v405_v40 = vsub.f32 %v388_v62, %v403_v63  ;;  %v1295_v2 = vrot.slane %v981_v57, %v1130_v8  ;;  %v1308_v62 = vrot.slane %v973_v46, %v1162_v15  ;;  %v1529_v63 = vunpack.c.h.bf16 %v1135_v9 }
  0x19   : > { %v439_v58 = vadd.f32 %v437_v51, %v404_v50  ;;  %v1260_v50 = vmul.f32 %v395_v26, %v371_v12  ;;  %v1262_v51 = vmul.f32 %v399_v45, %v372_v13  ;;  %v1278_v12 = vrot.slane %v980_v3, %v1130_v8  ;;  %v984_v13 = vld [vmem:[%s1151_s18 + $0x5] ss:$8 sm:$0x3] }
  0x1a   : > { %v410_v26 = vmul.f32 %v380_v25, %v374_v14  ;;  %v1283_v45 = vmul.f32 %v384_v44, %v375_v21  ;;  %v1298_v14 = vrot.slane %v984_v13, %v1130_v8  ;;  %v440_v21 = vadd.f32 %v438_v29, %v405_v40 }
  0x1b   : > { %v454_v27 = vsub.f32 %v439_v58, %v452_v52  ;;  %v537_v52 = vmul.f32 %v1246_v60, %v1523_v32  ;;  %v1275_v58 = vrot.slane %v977_v1, %v1130_v8  ;;  %v1528_v25 = vunpack.c.h.bf16 %v1126_v7 }
  0x1c   : > { %v587_v44 = vmul.f32 %v1278_v12, %v1526_v34  ;;  %v1313_v29 = vmul.f32 %v449_v20, %v421_v23  ;;  %v602_v46 = vmul.f32 %v1295_v2, %v1527_v41  ;;  %v989_v34 = vld [vmem:[%s1157_s24 + $0x6] ss:$8 sm:$0x3]  ;;  %v1329_v23 = vrot.slane %v977_v1, %v1162_v15 }
  0x1d   : > { %v489_v28 = vadd.f32 %v487_v0, %v454_v27  ;;  %v453_v0 = vmul.f32 %v449_v20, %v1532_v19  ;;  %v1289_v27 = vmul.f32 %v445_v39, %v420_v22  ;;  %v552_v30 = vmul.f32 %v1275_v58, %v1531_v33  ;;  %v992_v20 = vld [vmem:[%s1151_s18 + $0x7] ss:$8 sm:$0x3] }
  0x1e   : > { %v488_v22 = vmul.f32 %v1268_v61, %v1525_v38  ;;  %v1534_v38 = vunpack.c.h.bf16 %v1140_v10  ;;  %v503_v4 = vmul.f32 %v1308_v62, %v1528_v25  ;;  %v637_v41 = vmul.f32 %v1298_v14, %v1530_v48 }
  0x1f   : > { %v504_v32 = vsub.f32 %v489_v28, %v502_v37  ;;  %v985_v37 = vld [vmem:[%s1157_s24 + $0x5] ss:$8 sm:$0x3]  ;;  %v988_v28 = vld [vmem:[%s1151_s18 + $0x6] ss:$8 sm:$0x3]  ;;  %v455_v40 = vsub.f32 %v440_v21, %v453_v0  ;;  %v1337_v21 = vrot.slane %v980_v3, %v1162_v15  ;;  %v1360_v33 = vrot.slane %v992_v20, %v1130_v8 }
  0x20   : > { %v1343_v25 = vrot.slane %v985_v37, %v1130_v8  ;;  %v1346_v1 = vrot.slane %v988_v28, %v1130_v8  ;;  %v553_v3 = vmul.f32 %v1329_v23, %v1534_v38  ;;  %v1363_v19 = vrot.slane %v981_v57, %v1162_v15 }
  0x21   : > { %v539_v39 = vadd.f32 %v537_v52, %v504_v32  ;;  %v1319_v32 = vrot.slane %v976_v47, %v1162_v15  ;;  %v490_v0 = vadd.f32 %v488_v22, %v455_v40  ;;  %v1349_v22 = vrot.slane %v989_v34, %v1130_v8  ;;  %v993_v40 = vld [vmem:[%s1157_s24 + $0x7] ss:$8 sm:$0x3] }
  0x22   : > { %v652_v48 = vmul.f32 %v1343_v25, %v1536_v49  ;;  %v1370_v38 = vrot.slane %v984_v13, %v1162_v15  ;;  %v1387_v49 = vrot.slane %v988_v28, %v1162_v15  ;;  %v1543_v28 = vunpack.c.l.bf16 %v1220_v43 }
  0x23   : > { %v554_v52 = vsub.f32 %v539_v39, %v552_v30  ;;  %v538_v47 = vmul.f32 %v1319_v32, %v1529_v63  ;;  %v1535_v30 = vunpack.c.h.bf16 %v1145_v11  ;;  %v505_v63 = vsub.f32 %v490_v0, %v503_v4 }
  0x24   : > { %v702_v57 = vmul.f32 %v1349_v22, %v1538_v56  ;;  %v1540_v56 = vunpack.c.l.bf16 %v1116_v5 }
  0x25   : > { %v589_v39 = vadd.f32 %v587_v44, %v554_v52  ;;  %v1539_v44 = vunpack.c.h.bf16 %v1167_v16  ;;  %v540_v24 = vadd.f32 %v538_v47, %v505_v63  ;;  %v588_v4 = vmul.f32 %v1337_v21, %v1535_v30 }
  0x26   : > { %v1379_v63 = vrot.slane %v993_v40, %v1130_v8  ;;  %v460_v8 = vmul.f32 %v1192_v31, %v1540_v56  ;;  %v1544_v31 = vunpack.c.l.bf16 %v1121_v6 }
  0x27   : > { %v604_v52 = vsub.f32 %v589_v39, %v602_v46  ;;  %v687_v39 = vmul.f32 %v1346_v1, %v1537_v53  ;;  %v555_v47 = vsub.f32 %v540_v24, %v553_v3  ;;  %v603_v30 = vmul.f32 %v1363_v19, %v1539_v44 }
  0x28   : > { %v412_v53 = vadd.f32 %v410_v26, %v1260_v50  ;;  %v1541_v24 = vunpack.c.l.bf16 %v1215_v42  ;;  %v1542_v44 = vunpack.c.h.bf16 %v1172_v17  ;;  %v752_v50 = vmul.f32 %v1379_v63, %v1543_v28 }
  0x29   : > { %v639_v46 = vadd.f32 %v637_v41, %v604_v52  ;;  %v590_v0 = vadd.f32 %v588_v4, %v555_v47  ;;  %v506_v56 = vmul.f32 %v1243_v59, %v1544_v31  ;;  %v1545_v4 = vunpack.c.h.bf16 %v1177_v18 }
  0x2a   : > { %v737_v3 = vmul.f32 %v1360_v33, %v1541_v24  ;;  %v638_v13 = vmul.f32 %v1370_v38, %v1542_v44  ;;  %v458_v26 = vadd.f32 %v1289_v27, %v412_v53  ;;  %v675_v44 = vunpack.c.h.bf16 %v1205_v36 }
  0x2b   : > { %v654_v52 = vsub.f32 %v639_v46, %v652_v48  ;;  %v649_v48 = vrot.slane %v985_v37, %v1162_v15  ;;  %v605_v41 = vsub.f32 %v590_v0, %v603_v30  ;;  %v699_v37 = vrot.slane %v989_v34, %v1162_v15 }
  0x2c   : > { %v462_v28 = vadd.f32 %v460_v8, %v458_v26  ;;  %v1547_v53 = vunpack.c.l.bf16 %v1126_v7  ;;  %v721_v30 = vunpack.c.h.bf16 %v1215_v42  ;;  %v1419_v0 = vrot.slane %v992_v20, %v1162_v15 }
  0x2d   : > { %v689_v46 = vadd.f32 %v687_v39, %v654_v52  ;;  %v653_v47 = vmul.f32 %v649_v48, %v1545_v4  ;;  %v1546_v52 = vunpack.c.h.bf16 %v1200_v35  ;;  %v640_v59 = vadd.f32 %v638_v13, %v605_v41 }
  0x2e   : > { %v510_v27 = vmul.f32 %v1238_v55, %v1547_v53  ;;  %v1548_v31 = vunpack.c.l.bf16 %v1135_v9  ;;  %v413_v4 = vadd.f32 %v1283_v45, %v1262_v51  ;;  %v1549_v8 = vunpack.c.h.bf16 %v1116_v5 }
  0x2f   : > { %v704_v39 = vsub.f32 %v689_v46, %v702_v57  ;;  %v688_v24 = vmul.f32 %v1387_v49, %v1546_v52  ;;  %v508_v46 = vadd.f32 %v506_v56, %v462_v28  ;;  %v655_v55 = vsub.f32 %v640_v59, %v653_v47 }
  0x30   : > { %v556_v34 = vmul.f32 %v1275_v58, %v1548_v31  ;;  %v461_v26 = vmul.f32 %v1235_v54, %v1549_v8  ;;  %v703_v20 = vmul.f32 %v699_v37, %v675_v44  ;;  %v725_v58 = vunpack.c.h.bf16 %v1220_v43 }
  0x31   : > { %v739_v57 = vadd.f32 %v737_v3, %v704_v39  ;;  %v1550_v13 = vunpack.c.l.bf16 %v1140_v10  ;;  %v512_v5 = vadd.f32 %v510_v27, %v508_v46  ;;  %v459_v54 = vadd.f32 %v1313_v29, %v413_v4 }
  0x32   : > { %v1551_v41 = vunpack.c.h.bf16 %v1121_v6  ;;  %v690_v56 = vadd.f32 %v688_v24, %v655_v55  ;;  %v738_v47 = vmul.f32 %v1419_v0, %v721_v30  ;;  %v749_v39 = vrot.slane %v993_v40, %v1162_v15 }
  0x33   : > { %v560_v51 = vmul.f32 %v1246_v60, %v1550_v13  ;;  %v754_v45 = vsub.f32 %v739_v57, %v752_v50  ;;  %v558_v52 = vadd.f32 %v556_v34, %v512_v5  ;;  %v1552_v28 = vunpack.c.l.bf16 %v1145_v11 }
  0x34   : > { %v507_v3 = vmul.f32 %v1308_v62, %v1551_v41  ;;  %v463_v50 = vadd.f32 %v461_v26, %v459_v54  ;;  %v1553_v29 = vunpack.c.h.bf16 %v1126_v7  ;;  %v705_v53 = vsub.f32 %v690_v56, %v703_v20 }
  0x35   : > { %764 = vst [vmem:[%s1433_s17] sm:$0xff] %v754_v45  ;;  %v606_v60 = vmul.f32 %v1295_v2, %v1552_v28  ;;  %v753_v62 = vmul.f32 %v749_v39, %v725_v58  ;;  %v562_v24 = vadd.f32 %v560_v51, %v558_v52  ;;  %v1554_v27 = vunpack.c.l.bf16 %v1167_v16 }
  0x36   : > { %v511_v6 = vmul.f32 %v1268_v61, %v1553_v29  ;;  %v509_v15 = vadd.f32 %v507_v3, %v463_v50  ;;  %v1555_v40 = vunpack.c.h.bf16 %v1135_v9  ;;  %v740_v34 = vadd.f32 %v738_v47, %v705_v53 }
  0x37   : > { %v610_v59 = vmul.f32 %v1278_v12, %v1554_v27  ;;  %v608_v2 = vadd.f32 %v606_v60, %v562_v24  ;;  %v1556_v57 = vunpack.c.l.bf16 %v1172_v17  ;;  %v1557_v46 = vunpack.c.h.bf16 %v1140_v10 }
  0x38   : > { %v557_v31 = vmul.f32 %v1329_v23, %v1555_v40  ;;  %v513_v61 = vadd.f32 %v511_v6, %v509_v15  ;;  %v755_v8 = vsub.f32 %v740_v34, %v753_v62  ;;  %v1558_v12 = vunpack.c.l.bf16 %v1177_v18 }
  0x39   : > { %v656_v7 = vmul.f32 %v1343_v25, %v1556_v57  ;;  %v561_v4 = vmul.f32 %v1319_v32, %v1557_v46  ;;  %v612_v26 = vadd.f32 %v610_v59, %v608_v2  ;;  %v1559_v23 = vunpack.c.h.bf16 %v1145_v11 }
  0x3a   : > { %v660_v55 = vmul.f32 %v1298_v14, %v1558_v12  ;;  %v559_v9 = vadd.f32 %v557_v31, %v513_v61  ;;  %765 = vst [vmem:[%s1433_s17 + $0x8] sm:$0xff] %v755_v8  ;;  %v1560_v25 = vunpack.c.l.bf16 %v1200_v35  ;;  %v1561_v32 = vunpack.c.h.bf16 %v1167_v16 }
  0x3b   : > { %v607_v20 = vmul.f32 %v1363_v19, %v1559_v23  ;;  %v658_v13 = vadd.f32 %v656_v7, %v612_v26  ;;  %v1562_v14 = vunpack.c.l.bf16 %v1205_v36  ;;  %v1563_v19 = vunpack.c.h.bf16 %v1172_v17 }
  0x3c   : > { %v706_v51 = vmul.f32 %v1349_v22, %v1560_v25  ;;  %v563_v10 = vadd.f32 %v561_v4, %v559_v9  ;;  %v611_v45 = vmul.f32 %v1337_v21, %v1561_v32  ;;  %v1564_v56 = vunpack.c.l.bf16 %v1215_v42 }
  0x3d   : > { %v662_v5 = vadd.f32 %v660_v55, %v658_v13  ;;  %v710_v54 = vmul.f32 %v1346_v1, %v1562_v14  ;;  %v657_v41 = vmul.f32 %v649_v48, %v1563_v19  ;;  %v1565_v16 = vunpack.c.h.bf16 %v1177_v18 }
  0x3e   : > { %v609_v11 = vadd.f32 %v607_v20, %v563_v10  ;;  %v756_v22 = vmul.f32 %v1379_v63, %v1564_v56  ;;  %v1566_v28 = vunpack.c.l.bf16 %v1220_v43  ;;  %v1567_v50 = vunpack.c.h.bf16 %v1200_v35 }
  0x3f   : > { %v708_v3 = vadd.f32 %v706_v51, %v662_v5  ;;  %v661_v21 = vmul.f32 %v1370_v38, %v1565_v16  ;;  %v711_v63 = vmul.f32 %v1387_v49, %v675_v44  ;;  %v757_v43 = vmul.f32 %v749_v39, %v721_v30 }
  0x40   : > { %v613_v47 = vadd.f32 %v611_v45, %v609_v11  ;;  %v760_v60 = vmul.f32 %v1360_v33, %v1566_v28  ;;  %v707_v17 = vmul.f32 %v699_v37, %v1567_v50  ;;  %v761_v35 = vmul.f32 %v1419_v0, %v725_v58 }
  0x41   : > { %v712_v52 = vadd.f32 %v710_v54, %v708_v3 }
  0x42   : > { %v659_v1 = vadd.f32 %v657_v41, %v613_v47 }
  0x43   : > { %v758_v48 = vadd.f32 %v756_v22, %v712_v52 }
  0x44   : > { %v663_v29 = vadd.f32 %v661_v21, %v659_v1 }
  0x45   : > { %v762_v18 = vadd.f32 %v760_v60, %v758_v48 }
  0x46   : > { %v709_v38 = vadd.f32 %v707_v17, %v663_v29 }
  0x47   : > { %766 = vst [vmem:[%s366_s23] sm:$0xff] %v762_v18 }
  0x48   : > { %v713_v33 = vadd.f32 %v711_v63, %v709_v38 }
  0x4a   : > { %v759_v37 = vadd.f32 %v757_v43, %v713_v33 }
  0x4c   : > { %v763_v6 = vadd.f32 %v761_v35, %v759_v37 }
  0x4e   : > { %767 = vst [vmem:[%s366_s23 + $0x8] sm:$0xff] %v763_v6 }
  0x4f PF: > { %s16_s20 = sadd.s32 1, %s1048_s20   ;;  %s1568_s18 = smov %s1044_s19 }
  0x50   : > { %p13_p5 = scmp.ge.s32.totalorder %s16_s20, 4   ;;  %s1569_s19 = smov %s1571_s21 }
  0x52   :  { %15 = sbr.rel (!%p13_p5) target bundleno = 2 (0x2), region = 115 }

// kernel: reverse.8
= control target key start
LH: loop header
LB: loop body
LE: loop exit
PB: predicated region body
PF: predicated region fallthrough
CT: control target
= control target key end

     0   :  { %s584_s0 = inlined_call_operand.vmem [shape: f32[8,2,8,8,3], index: 0, kind: input, shape index: {}]   ;;  %s585_s1 = inlined_call_operand.vmem [shape: f32[8,2,8,8,3], index: 1, kind: output, shape index: {}]  }
   0x1   :  { %v192_v0 = vld [vmem:[%s584_s0 + $0x10] sm:$0xff]  ;;  %v193_v1 = vld [vmem:[%s584_s0 + $0x40] sm:$0xff]  ;;  %v207_v8 = vld [vmem:[%s584_s0 + $0x28] sm:$0xff] }
   0x2   :  { %v195_v2 = vld [vmem:[%s584_s0 + $0x70] sm:$0xff]  ;;  %4 = vst [vmem:[%s585_s1] sm:$0xff] %v192_v0  ;;  %194 = vst [vmem:[%s585_s1 + $0x30] sm:$0xff] %v193_v1  ;;  %v197_v3 = vld [vmem:[%s584_s0 + $0xa0] sm:$0xff] }
   0x3   :  { %196 = vst [vmem:[%s585_s1 + $0x60] sm:$0xff] %v195_v2  ;;  %v199_v4 = vld [vmem:[%s584_s0 + $0xd0] sm:$0xff]  ;;  %v201_v5 = vld [vmem:[%s584_s0 + $0x100] sm:$0xff]  ;;  %198 = vst [vmem:[%s585_s1 + $0x90] sm:$0xff] %v197_v3 }
   0x4   :  { %200 = vst [vmem:[%s585_s1 + $0xc0] sm:$0xff] %v199_v4  ;;  %202 = vst [vmem:[%s585_s1 + $0xf0] sm:$0xff] %v201_v5  ;;  %v203_v6 = vld [vmem:[%s584_s0 + $0x130] sm:$0xff]  ;;  %v205_v7 = vld [vmem:[%s584_s0 + $0x160] sm:$0xff] }
   0x5   :  { %204 = vst [vmem:[%s585_s1 + $0x120] sm:$0xff] %v203_v6  ;;  %206 = vst [vmem:[%s585_s1 + $0x150] sm:$0xff] %v205_v7  ;;  %v209_v9 = vld [vmem:[%s584_s0 + $0x58] sm:$0xff]  ;;  %v211_v10 = vld [vmem:[%s584_s0 + $0x88] sm:$0xff] }
   0x6   :  { %208 = vst [vmem:[%s585_s1 + $0x18] sm:$0xff] %v207_v8  ;;  %v213_v11 = vld [vmem:[%s584_s0 + $0xb8] sm:$0xff]  ;;  %210 = vst [vmem:[%s585_s1 + $0x48] sm:$0xff] %v209_v9  ;;  %v215_v12 = vld [vmem:[%s584_s0 + $0xe8] sm:$0xff] }
   0x7   :  { %212 = vst [vmem:[%s585_s1 + $0x78] sm:$0xff] %v211_v10  ;;  %214 = vst [vmem:[%s585_s1 + $0xa8] sm:$0xff] %v213_v11  ;;  %v217_v13 = vld [vmem:[%s584_s0 + $0x118] sm:$0xff]  ;;  %v219_v14 = vld [vmem:[%s584_s0 + $0x148] sm:$0xff] }
   0x8   :  { %216 = vst [vmem:[%s585_s1 + $0xd8] sm:$0xff] %v215_v12  ;;  %218 = vst [vmem:[%s585_s1 + $0x108] sm:$0xff] %v217_v13  ;;  %v221_v15 = vld [vmem:[%s584_s0 + $0x178] sm:$0xff]  ;;  %v223_v16 = vld [vmem:[%s584_s0 + $0x8] sm:$0xff] }
   0x9   :  { %220 = vst [vmem:[%s585_s1 + $0x138] sm:$0xff] %v219_v14  ;;  %v225_v17 = vld [vmem:[%s584_s0 + $0x38] sm:$0xff]  ;;  %222 = vst [vmem:[%s585_s1 + $0x168] sm:$0xff] %v221_v15  ;;  %v227_v18 = vld [vmem:[%s584_s0 + $0x68] sm:$0xff] }
   0xa   :  { %224 = vst [vmem:[%s585_s1 + $0x8] sm:$0xff] %v223_v16  ;;  %226 = vst [vmem:[%s585_s1 + $0x38] sm:$0xff] %v225_v17  ;;  %v229_v19 = vld [vmem:[%s584_s0 + $0x98] sm:$0xff]  ;;  %v231_v20 = vld [vmem:[%s584_s0 + $0xc8] sm:$0xff] }
   0xb   :  { %228 = vst [vmem:[%s585_s1 + $0x68] sm:$0xff] %v227_v18  ;;  %230 = vst [vmem:[%s585_s1 + $0x98] sm:$0xff] %v229_v19  ;;  %v233_v21 = vld [vmem:[%s584_s0 + $0xf8] sm:$0xff]  ;;  %v235_v22 = vld [vmem:[%s584_s0 + $0x128] sm:$0xff] }
   0xc   :  { %232 = vst [vmem:[%s585_s1 + $0xc8] sm:$0xff] %v231_v20  ;;  %v237_v23 = vld [vmem:[%s584_s0 + $0x158] sm:$0xff]  ;;  %234 = vst [vmem:[%s585_s1 + $0xf8] sm:$0xff] %v233_v21  ;;  %v239_v24 = vld [vmem:[%s584_s0 + $0x20] sm:$0xff] }
   0xd   :  { %236 = vst [vmem:[%s585_s1 + $0x128] sm:$0xff] %v235_v22  ;;  %238 = vst [vmem:[%s585_s1 + $0x158] sm:$0xff] %v237_v23  ;;  %v241_v25 = vld [vmem:[%s584_s0 + $0x50] sm:$0xff]  ;;  %v243_v26 = vld [vmem:[%s584_s0 + $0x80] sm:$0xff] }
   0xe   :  { %240 = vst [vmem:[%s585_s1 + $0x20] sm:$0xff] %v239_v24  ;;  %242 = vst [vmem:[%s585_s1 + $0x50] sm:$0xff] %v241_v25  ;;  %v245_v27 = vld [vmem:[%s584_s0 + $0xb0] sm:$0xff]  ;;  %v247_v28 = vld [vmem:[%s584_s0 + $0xe0] sm:$0xff] }
   0xf   :  { %244 = vst [vmem:[%s585_s1 + $0x80] sm:$0xff] %v243_v26  ;;  %v249_v29 = vld [vmem:[%s584_s0 + $0x110] sm:$0xff]  ;;  %246 = vst [vmem:[%s585_s1 + $0xb0] sm:$0xff] %v245_v27  ;;  %v251_v30 = vld [vmem:[%s584_s0 + $0x140] sm:$0xff] }
  0x10   :  { %248 = vst [vmem:[%s585_s1 + $0xe0] sm:$0xff] %v247_v28  ;;  %250 = vst [vmem:[%s585_s1 + $0x110] sm:$0xff] %v249_v29  ;;  %v253_v31 = vld [vmem:[%s584_s0 + $0x170] sm:$0xff]  ;;  %v129_v32 = vld [vmem:[%s584_s0] sm:$0xff] }
  0x11   :  { %252 = vst [vmem:[%s585_s1 + $0x140] sm:$0xff] %v251_v30  ;;  %254 = vst [vmem:[%s585_s1 + $0x170] sm:$0xff] %v253_v31  ;;  %v256_v33 = vld [vmem:[%s584_s0 + $0x30] sm:$0xff]  ;;  %v258_v34 = vld [vmem:[%s584_s0 + $0x60] sm:$0xff] }
  0x12   :  { %255 = vst [vmem:[%s585_s1 + $0x10] sm:$0xff] %v129_v32  ;;  %v260_v35 = vld [vmem:[%s584_s0 + $0x90] sm:$0xff]  ;;  %257 = vst [vmem:[%s585_s1 + $0x40] sm:$0xff] %v256_v33  ;;  %v262_v36 = vld [vmem:[%s584_s0 + $0xc0] sm:$0xff] }
  0x13   :  { %259 = vst [vmem:[%s585_s1 + $0x70] sm:$0xff] %v258_v34  ;;  %261 = vst [vmem:[%s585_s1 + $0xa0] sm:$0xff] %v260_v35  ;;  %v264_v37 = vld [vmem:[%s584_s0 + $0xf0] sm:$0xff]  ;;  %v266_v38 = vld [vmem:[%s584_s0 + $0x120] sm:$0xff] }
  0x14   :  { %263 = vst [vmem:[%s585_s1 + $0xd0] sm:$0xff] %v262_v36  ;;  %265 = vst [vmem:[%s585_s1 + $0x100] sm:$0xff] %v264_v37  ;;  %v268_v39 = vld [vmem:[%s584_s0 + $0x150] sm:$0xff]  ;;  %v270_v40 = vld [vmem:[%s584_s0 + $0x18] sm:$0xff] }
  0x15   :  { %267 = vst [vmem:[%s585_s1 + $0x130] sm:$0xff] %v266_v38  ;;  %v272_v41 = vld [vmem:[%s584_s0 + $0x48] sm:$0xff]  ;;  %269 = vst [vmem:[%s585_s1 + $0x160] sm:$0xff] %v268_v39  ;;  %v274_v42 = vld [vmem:[%s584_s0 + $0x78] sm:$0xff] }
  0x16   :  { %271 = vst [vmem:[%s585_s1 + $0x28] sm:$0xff] %v270_v40  ;;  %273 = vst [vmem:[%s585_s1 + $0x58] sm:$0xff] %v272_v41  ;;  %v276_v43 = vld [vmem:[%s584_s0 + $0xa8] sm:$0xff]  ;;  %v278_v44 = vld [vmem:[%s584_s0 + $0xd8] sm:$0xff] }
  0x17   :  { %275 = vst [vmem:[%s585_s1 + $0x88] sm:$0xff] %v274_v42  ;;  %277 = vst [vmem:[%s585_s1 + $0xb8] sm:$0xff] %v276_v43  ;;  %v280_v45 = vld [vmem:[%s584_s0 + $0x108] sm:$0xff]  ;;  %v282_v46 = vld [vmem:[%s584_s0 + $0x138] sm:$0xff] }
  0x18   :  { %279 = vst [vmem:[%s585_s1 + $0xe8] sm:$0xff] %v278_v44  ;;  %v284_v47 = vld [vmem:[%s584_s0 + $0x168] sm:$0xff]  ;;  %281 = vst [vmem:[%s585_s1 + $0x118] sm:$0xff] %v280_v45 }
  0x19   :  { %283 = vst [vmem:[%s585_s1 + $0x148] sm:$0xff] %v282_v46  ;;  %285 = vst [vmem:[%s585_s1 + $0x178] sm:$0xff] %v284_v47 }

// kernel: simple_block3d_forward.12
= control target key start
LH: loop header
LB: loop body
LE: loop exit
PB: predicated region body
PF: predicated region fallthrough
CT: control target
= control target key end

     0   :  { %s647_s15 = smov 0   ;;  %s747_s0 = inlined_call_operand.vmem [shape: bf16[8,1024], index: 0, kind: input, shape index: {}]   ;;  %s748_s1 = inlined_call_operand.vmem [shape: bf16[8,8], index: 1, kind: input, shape index: {}]   ;;  %s749_s2 = inlined_call_operand.vmem [shape: f32[8,1], index: 2, kind: input, shape index: {}]   ;;  %s750_s3 = inlined_call_operand.vmem [shape: f32[8,1024], index: 3, kind: input, shape index: {}]   ;;  %s751_s4 = inlined_call_operand.vmem [shape: bf16[8,1024], index: 4, kind: output, shape index: {}]  }
   0x1 LB: > { %s564_s16 = sadd.s32 4294967295, %s612_s15   ;;  %p568_p0 = scmp.ge.s32.totalorder %s612_s15, 1  ;;  %s612_s15 = sphi %s647_s15, %s14_s15  }
   0x2   : > { %p174_p1 = scmp.lt.s32.totalorder %s612_s15, 3 }
   0x4   : > { %p175_p2 = pnand %p568_p0, %p174_p1 }
   0x5   : > { %v229_v0 = vld [vmem:[%s748_s1] sm:$0xf] (!%p175_p2)  ;;  %v614_v1 = vmov (!%p175_p2), 2   ;;  %v615_v2 = vmov (!%p175_p2), 0   ;;  %v616_v4 = vmov (!%p175_p2), 3   ;;  %v617_v5 = vmov (!%p175_p2), 1  }
   0x6   : > { %178 = sbr.rel (%p175_p2) target bundleno = 169 (0xa9), region = 36  ;;  %599 = vset.pattern.permute.xlu1 (!%p175_p2), %v614_v1  ;;  %597 = vset.pattern.permute.xlu0 (!%p175_p2), %v615_v2  ;;  %v230_v3 = vunpack.c.l.bf16 (!%p175_p2), %v229_v0  ;;  %v618_v6 = vmov (!%p175_p2), 4   ;;  %v619_v7 = vmov (!%p175_p2), 5   ;;  %v456_v8 = vld [vmem:[%s749_s2] sm:$0xff] (!%p175_p2)  ;;  %v620_v9 = vmov (!%p175_p2), 6   ;;  %s569_s21 = sshll.u32 (!%p175_p2), %s564_s16, 2 }
   0x7   : > { %v621_v10 = vmov (!%p175_p2), 7   ;;  %p206_p3 = scmp.lt.s32.totalorder (!%p175_p2), %s569_s21, 7  ;;  %v236_v11 = vlaneseq (!%p175_p2) }
   0x8   : > { %289 = vperm.xlu1 (!%p175_p2), %599, %v230_v3   ;;  %233 = vperm.xlu0 (!%p175_p2), %597, %v230_v3  }
   0x9   : > { %v237_v12 = vshrl.u32 (!%p175_p2), %v236_v11, 7 }
   0xb   : > { %v294_v15 = vsub.s32 (!%p175_p2), 2, %v237_v12  ;;  %v238_v20 = vsub.s32 (!%p175_p2), 0, %v237_v12  ;;  %v322_v21 = vsub.s32 (!%p175_p2), 3, %v237_v12  ;;  %v266_v22 = vsub.s32 (!%p175_p2), 1, %v237_v12 }
   0xc   : > { %600 = vset.pattern.permute.xlu1 (!%p175_p2), %v616_v4  ;;  %598 = vset.pattern.permute.xlu0 (!%p175_p2), %v617_v5  ;;  %v682_v26 = vsub.s32 (!%p175_p2), 4, %v237_v12  ;;  %v691_v34 = vsub.s32 (!%p175_p2), 5, %v237_v12  ;;  %v696_v40 = vsub.s32 (!%p175_p2), 6, %v237_v12  ;;  %v701_v44 = vsub.s32 (!%p175_p2), 7, %v237_v12 }
   0xd   : > { %317 = vperm.xlu1 %600, %v230_v3   ;;  %261 = vperm.xlu0 %598, %v230_v3   ;;  %s753_s21 = smov (!%p206_p3, %s569_s21), 7 }
   0xe   : > { %s570_s22 = sshll.u32 %s753_s21, 2  ;;  %s572_s26 = sshll.u32 %s753_s21, 3 }
   0xf   : > { %s209_s25 = scalar_lea.vmem %s747_s0, %s570_s22  ;;  %s215_s29 = scalar_lea.vmem %s750_s3, %s572_s26 }
  0x10   : > { %v223_v13 = vld [vmem:[%s209_s25] sm:$0xff]  ;;  %v224_v14 = vld [vmem:[%s209_s25 + $0x8] sm:$0xff]  ;;  %s221_s6 = scalar_lea.vmem %s751_s4, %s570_s22 }
  0x11   : > { %601 = vset.pattern.permute.xlu1 %v618_v6  ;;  %602 = vset.pattern.permute.xlu0 %v619_v7  ;;  %v671_v16 = vunpack.c.l.bf16 %v223_v13  ;;  %v673_v17 = vunpack.c.h.bf16 %v223_v13  ;;  %v675_v18 = vunpack.c.l.bf16 %v224_v14  ;;  %v677_v19 = vunpack.c.h.bf16 %v224_v14 }
  0x12   : > { %345 = vperm.xlu1 %601, %v230_v3   ;;  %373 = vperm.xlu0 %602, %v230_v3  }
  0x13   : > { %v295_v23 = vrot.slane %v671_v16, %v294_v15  ;;  %v299_v24 = vrot.slane %v673_v17, %v294_v15  ;;  %v303_v25 = vrot.slane %v675_v18, %v294_v15  ;;  %v307_v27 = vrot.slane %v677_v19, %v294_v15 }
  0x14   : > { %v239_v28 = vrot.slane %v671_v16, %v238_v20  ;;  %v243_v29 = vrot.slane %v673_v17, %v238_v20  ;;  %v247_v30 = vrot.slane %v675_v18, %v238_v20  ;;  %v251_v31 = vrot.slane %v677_v19, %v238_v20 }
  0x15   : > { %v323_v32 = vrot.slane %v671_v16, %v322_v21  ;;  %v327_v33 = vrot.slane %v673_v17, %v322_v21  ;;  %v331_v37 = vrot.slane %v675_v18, %v322_v21  ;;  %v335_v38 = vrot.slane %v677_v19, %v322_v21 }
  0x16   : > { %603 = vset.pattern.permute.xlu1 %v620_v9  ;;  %605 = vset.pattern.permute.xlu0 %v615_v2  ;;  %v267_v39 = vrot.slane %v671_v16, %v266_v22  ;;  %v271_v41 = vrot.slane %v673_v17, %v266_v22  ;;  %v275_v42 = vrot.slane %v675_v18, %v266_v22 }
  0x17   : > { %401 = vperm.xlu1 %603, %v230_v3   ;;  %459 = vperm.xlu0 %605, %v456_v8   ;;  %v279_v43 = vrot.slane %v677_v19, %v266_v22  ;;  %v351_v45 = vrot.slane %v671_v16, %v682_v26  ;;  %v355_v46 = vrot.slane %v673_v17, %v682_v26 }
  0x18   : > { %v359_v47 = vrot.slane %v675_v18, %v682_v26  ;;  %v363_v48 = vrot.slane %v677_v19, %v682_v26  ;;  %v379_v49 = vrot.slane %v671_v16, %v691_v34  ;;  %v383_v50 = vrot.slane %v673_v17, %v691_v34 }
  0x19   : > { %v387_v51 = vrot.slane %v675_v18, %v691_v34  ;;  %v391_v52 = vrot.slane %v677_v19, %v691_v34  ;;  %v407_v53 = vrot.slane %v671_v16, %v696_v40  ;;  %v411_v54 = vrot.slane %v673_v17, %v696_v40 }
  0x1a   : > { %v415_v55 = vrot.slane %v675_v18, %v696_v40  ;;  %v419_v56 = vrot.slane %v677_v19, %v696_v40  ;;  %v435_v59 = vrot.slane %v671_v16, %v701_v44  ;;  %v439_v60 = vrot.slane %v673_v17, %v701_v44 }
  0x1b   : > { %604 = vset.pattern.permute.xlu1 %v621_v10  ;;  %v443_v61 = vrot.slane %v675_v18, %v701_v44  ;;  %v447_v62 = vrot.slane %v677_v19, %v701_v44 }
  0x1c   : > { %429 = vperm.xlu1 %604, %v230_v3  }
  0x87   : > { %v290_v35 = vpop.permute.xlu1 %289  ;;  %v234_v36 = vpop.permute.xlu0 %233 }
  0x88   : > { %v252_v63 = vmul.f32 %v239_v28, %v234_v36  ;;  %v253_v0 = vmul.f32 %v243_v29, %v234_v36  ;;  %v254_v1 = vmul.f32 %v247_v30, %v234_v36  ;;  %v255_v2 = vmul.f32 %v251_v31, %v234_v36 }
  0x89   : > { %v308_v7 = vmul.f32 %v295_v23, %v290_v35  ;;  %v309_v8 = vmul.f32 %v299_v24, %v290_v35  ;;  %v310_v9 = vmul.f32 %v303_v25, %v290_v35  ;;  %v311_v10 = vmul.f32 %v307_v27, %v290_v35 }
  0x8c   : > { %v318_v57 = vpop.permute.xlu1 %317  ;;  %v262_v58 = vpop.permute.xlu0 %261 }
  0x8d   : > { %v280_v3 = vmul.f32 %v267_v39, %v262_v58  ;;  %v281_v4 = vmul.f32 %v271_v41, %v262_v58  ;;  %v282_v5 = vmul.f32 %v275_v42, %v262_v58  ;;  %v283_v6 = vmul.f32 %v279_v43, %v262_v58 }
  0x8e   : > { %v336_v15 = vmul.f32 %v323_v32, %v318_v57  ;;  %v337_v16 = vmul.f32 %v327_v33, %v318_v57  ;;  %v338_v17 = vmul.f32 %v331_v37, %v318_v57  ;;  %v339_v18 = vmul.f32 %v335_v38, %v318_v57 }
  0x8f   : > { %v284_v11 = vadd.f32 %v280_v3, %v252_v63  ;;  %v285_v12 = vadd.f32 %v281_v4, %v253_v0  ;;  %v286_v13 = vadd.f32 %v282_v5, %v254_v1  ;;  %v287_v14 = vadd.f32 %v283_v6, %v255_v2  ;;  %v466_v4 = vld [vmem:[%s215_s29] sm:$0xff]  ;;  %v467_v5 = vld [vmem:[%s215_s29 + $0x8] sm:$0xff]  ;;  %v468_v6 = vld [vmem:[%s215_s29 + $0x10] sm:$0xff] }
  0x91   : > { %v346_v19 = vpop.permute.xlu1 %345  ;;  %v312_v20 = vadd.f32 %v308_v7, %v284_v11  ;;  %v313_v21 = vadd.f32 %v309_v8, %v285_v12  ;;  %v314_v22 = vadd.f32 %v310_v9, %v286_v13  ;;  %v315_v26 = vadd.f32 %v311_v10, %v287_v14  ;;  %v374_v28 = vpop.permute.xlu0 %373  ;;  %v469_v7 = vld [vmem:[%s215_s29 + $0x18] sm:$0xff] }
  0x92   : > { %v364_v29 = vmul.f32 %v351_v45, %v346_v19  ;;  %v365_v30 = vmul.f32 %v355_v46, %v346_v19  ;;  %v366_v23 = vmul.f32 %v359_v47, %v346_v19  ;;  %v367_v24 = vmul.f32 %v363_v48, %v346_v19 }
  0x93   : > { %v340_v25 = vadd.f32 %v336_v15, %v312_v20  ;;  %v341_v27 = vadd.f32 %v337_v16, %v313_v21  ;;  %v342_v31 = vadd.f32 %v338_v17, %v314_v22  ;;  %v343_v34 = vadd.f32 %v339_v18, %v315_v26 }
  0x94   : > { %v392_v35 = vmul.f32 %v379_v49, %v374_v28  ;;  %v393_v36 = vmul.f32 %v383_v50, %v374_v28  ;;  %v394_v32 = vmul.f32 %v387_v51, %v374_v28  ;;  %v395_v33 = vmul.f32 %v391_v52, %v374_v28 }
  0x95   : > { %v368_v37 = vadd.f32 %v364_v29, %v340_v25  ;;  %v369_v38 = vadd.f32 %v365_v30, %v341_v27  ;;  %v370_v39 = vadd.f32 %v366_v23, %v342_v31  ;;  %v371_v40 = vadd.f32 %v367_v24, %v343_v34 }
  0x96   : > { %v402_v41 = vpop.permute.xlu1 %401 }
  0x97   : > { %v420_v42 = vmul.f32 %v407_v53, %v402_v41  ;;  %v421_v43 = vmul.f32 %v411_v54, %v402_v41  ;;  %v422_v44 = vmul.f32 %v415_v55, %v402_v41  ;;  %v423_v45 = vmul.f32 %v419_v56, %v402_v41  ;;  %v460_v55 = vpop.permute.xlu0 %459 }
  0x98   : > { %v396_v46 = vadd.f32 %v392_v35, %v368_v37  ;;  %v397_v47 = vadd.f32 %v393_v36, %v369_v38  ;;  %v398_v48 = vadd.f32 %v394_v32, %v370_v39  ;;  %v399_v57 = vadd.f32 %v395_v33, %v371_v40 }
  0x9a   : > { %v424_v49 = vadd.f32 %v420_v42, %v396_v46  ;;  %v425_v50 = vadd.f32 %v421_v43, %v397_v47  ;;  %v426_v51 = vadd.f32 %v422_v44, %v398_v48  ;;  %v427_v52 = vadd.f32 %v423_v45, %v399_v57 }
  0x9b   : > { %v430_v58 = vpop.permute.xlu1 %429 }
  0x9c   : > { %v448_v63 = vmul.f32 %v435_v59, %v430_v58  ;;  %v449_v0 = vmul.f32 %v439_v60, %v430_v58  ;;  %v450_v53 = vmul.f32 %v443_v61, %v430_v58  ;;  %v451_v54 = vmul.f32 %v447_v62, %v430_v58 }
  0x9e   : > { %v452_v56 = vadd.f32 %v448_v63, %v424_v49  ;;  %v453_v1 = vadd.f32 %v449_v0, %v425_v50  ;;  %v454_v2 = vadd.f32 %v450_v53, %v426_v51  ;;  %v455_v3 = vadd.f32 %v451_v54, %v427_v52 }
  0xa0   : > { %v462_v8 = vadd.f32 %v460_v55, %v452_v56  ;;  %v463_v9 = vadd.f32 %v460_v55, %v453_v1  ;;  %v464_v10 = vadd.f32 %v460_v55, %v454_v2  ;;  %v465_v11 = vadd.f32 %v460_v55, %v455_v3 }
  0xa2   : > { %v470_v12 = vadd.f32 %v466_v4, %v462_v8  ;;  %v471_v13 = vadd.f32 %v467_v5, %v463_v9  ;;  %v472_v59 = vadd.f32 %v468_v6, %v464_v10  ;;  %v473_v60 = vadd.f32 %v469_v7, %v465_v11 }
  0xa4   : > { %v474_v61 = vmax.f32 %v470_v12, 0.0  ;;  %v475_v62 = vmax.f32 %v471_v13, 0.0  ;;  %v476_v14 = vmax.f32 %v472_v59, 0.0  ;;  %v477_v15 = vmax.f32 %v473_v60, 0.0 }
  0xa6   : > { %v579_v16 = vpack.c.bf16 %v475_v62, %v474_v61  ;;  %v580_v17 = vpack.c.bf16 %v477_v15, %v476_v14 }
  0xa8   : > { %494 = vst [vmem:[%s221_s6] sm:$0xff] %v579_v16  ;;  %495 = vst [vmem:[%s221_s6 + $0x8] sm:$0xff] %v580_v17 }
  0xa9 PF: > { %s14_s15 = sadd.s32 1, %s612_s15  }
  0xaa   : > { %p11_p4 = scmp.ge.s32.totalorder %s14_s15, 4  }
  0xac   :  { %13 = sbr.rel (!%p11_p4) target bundleno = 1 (0x1), region = 69 }

// kernel: simple_block3d_forward.18
= control target key start
LH: loop header
LB: loop body
LE: loop exit
PB: predicated region body
PF: predicated region fallthrough
CT: control target
= control target key end

     0   :  { %s643_s15 = smov 0   ;;  %s743_s0 = inlined_call_operand.vmem [shape: bf16[8,1024], index: 0, kind: input, shape index: {}]   ;;  %s744_s1 = inlined_call_operand.vmem [shape: bf16[8,8], index: 1, kind: input, shape index: {}]   ;;  %s745_s2 = inlined_call_operand.vmem [shape: f32[8,1], index: 2, kind: input, shape index: {}]   ;;  %s746_s3 = inlined_call_operand.vmem [shape: f32[8,1024], index: 3, kind: input, shape index: {}]   ;;  %s747_s4 = inlined_call_operand.vmem [shape: bf16[8,1024], index: 4, kind: output, shape index: {}]  }
   0x1 LB: > { %s560_s16 = sadd.s32 4294967295, %s608_s15   ;;  %p564_p0 = scmp.ge.s32.totalorder %s608_s15, 1  ;;  %s608_s15 = sphi %s643_s15, %s14_s15  }
   0x2   : > { %p174_p1 = scmp.lt.s32.totalorder %s608_s15, 3 }
   0x4   : > { %p175_p2 = pnand %p564_p0, %p174_p1 }
   0x5   : > { %v229_v0 = vld [vmem:[%s744_s1] sm:$0xf] (!%p175_p2)  ;;  %v610_v1 = vmov (!%p175_p2), 2   ;;  %v611_v2 = vmov (!%p175_p2), 0   ;;  %v612_v4 = vmov (!%p175_p2), 3   ;;  %v613_v5 = vmov (!%p175_p2), 1  }
   0x6   : > { %178 = sbr.rel (%p175_p2) target bundleno = 167 (0xa7), region = 36  ;;  %595 = vset.pattern.permute.xlu1 (!%p175_p2), %v610_v1  ;;  %593 = vset.pattern.permute.xlu0 (!%p175_p2), %v611_v2  ;;  %v230_v3 = vunpack.c.l.bf16 (!%p175_p2), %v229_v0  ;;  %v614_v6 = vmov (!%p175_p2), 4   ;;  %v615_v7 = vmov (!%p175_p2), 5   ;;  %v456_v8 = vld [vmem:[%s745_s2] sm:$0xff] (!%p175_p2)  ;;  %v616_v9 = vmov (!%p175_p2), 6   ;;  %s565_s21 = sshll.u32 (!%p175_p2), %s560_s16, 2 }
   0x7   : > { %v617_v10 = vmov (!%p175_p2), 7   ;;  %p206_p3 = scmp.lt.s32.totalorder (!%p175_p2), %s565_s21, 7  ;;  %v236_v11 = vlaneseq (!%p175_p2) }
   0x8   : > { %289 = vperm.xlu1 (!%p175_p2), %595, %v230_v3   ;;  %233 = vperm.xlu0 (!%p175_p2), %593, %v230_v3  }
   0x9   : > { %v237_v12 = vshrl.u32 (!%p175_p2), %v236_v11, 7 }
   0xb   : > { %v294_v15 = vsub.s32 (!%p175_p2), 2, %v237_v12  ;;  %v238_v20 = vsub.s32 (!%p175_p2), 0, %v237_v12  ;;  %v322_v21 = vsub.s32 (!%p175_p2), 3, %v237_v12  ;;  %v266_v22 = vsub.s32 (!%p175_p2), 1, %v237_v12 }
   0xc   : > { %596 = vset.pattern.permute.xlu1 (!%p175_p2), %v612_v4  ;;  %594 = vset.pattern.permute.xlu0 (!%p175_p2), %v613_v5  ;;  %v678_v26 = vsub.s32 (!%p175_p2), 4, %v237_v12  ;;  %v687_v34 = vsub.s32 (!%p175_p2), 5, %v237_v12  ;;  %v692_v40 = vsub.s32 (!%p175_p2), 6, %v237_v12  ;;  %v697_v44 = vsub.s32 (!%p175_p2), 7, %v237_v12 }
   0xd   : > { %317 = vperm.xlu1 %596, %v230_v3   ;;  %261 = vperm.xlu0 %594, %v230_v3   ;;  %s749_s21 = smov (!%p206_p3, %s565_s21), 7 }
   0xe   : > { %s566_s22 = sshll.u32 %s749_s21, 2  ;;  %s568_s26 = sshll.u32 %s749_s21, 3 }
   0xf   : > { %s209_s25 = scalar_lea.vmem %s743_s0, %s566_s22  ;;  %s215_s29 = scalar_lea.vmem %s746_s3, %s568_s26 }
  0x10   : > { %v223_v13 = vld [vmem:[%s209_s25] sm:$0xff]  ;;  %v224_v14 = vld [vmem:[%s209_s25 + $0x8] sm:$0xff]  ;;  %s221_s6 = scalar_lea.vmem %s747_s4, %s566_s22 }
  0x11   : > { %597 = vset.pattern.permute.xlu1 %v614_v6  ;;  %598 = vset.pattern.permute.xlu0 %v615_v7  ;;  %v667_v16 = vunpack.c.l.bf16 %v223_v13  ;;  %v669_v17 = vunpack.c.h.bf16 %v223_v13  ;;  %v671_v18 = vunpack.c.l.bf16 %v224_v14  ;;  %v673_v19 = vunpack.c.h.bf16 %v224_v14 }
  0x12   : > { %345 = vperm.xlu1 %597, %v230_v3   ;;  %373 = vperm.xlu0 %598, %v230_v3  }
  0x13   : > { %v295_v23 = vrot.slane %v667_v16, %v294_v15  ;;  %v299_v24 = vrot.slane %v669_v17, %v294_v15  ;;  %v303_v25 = vrot.slane %v671_v18, %v294_v15  ;;  %v307_v27 = vrot.slane %v673_v19, %v294_v15 }
  0x14   : > { %v239_v28 = vrot.slane %v667_v16, %v238_v20  ;;  %v243_v29 = vrot.slane %v669_v17, %v238_v20  ;;  %v247_v30 = vrot.slane %v671_v18, %v238_v20  ;;  %v251_v31 = vrot.slane %v673_v19, %v238_v20 }
  0x15   : > { %v323_v32 = vrot.slane %v667_v16, %v322_v21  ;;  %v327_v33 = vrot.slane %v669_v17, %v322_v21  ;;  %v331_v37 = vrot.slane %v671_v18, %v322_v21  ;;  %v335_v38 = vrot.slane %v673_v19, %v322_v21 }
  0x16   : > { %599 = vset.pattern.permute.xlu1 %v616_v9  ;;  %601 = vset.pattern.permute.xlu0 %v611_v2  ;;  %v267_v39 = vrot.slane %v667_v16, %v266_v22  ;;  %v271_v41 = vrot.slane %v669_v17, %v266_v22  ;;  %v275_v42 = vrot.slane %v671_v18, %v266_v22 }
  0x17   : > { %401 = vperm.xlu1 %599, %v230_v3   ;;  %459 = vperm.xlu0 %601, %v456_v8   ;;  %v279_v43 = vrot.slane %v673_v19, %v266_v22  ;;  %v351_v45 = vrot.slane %v667_v16, %v678_v26  ;;  %v355_v46 = vrot.slane %v669_v17, %v678_v26 }
  0x18   : > { %v359_v47 = vrot.slane %v671_v18, %v678_v26  ;;  %v363_v48 = vrot.slane %v673_v19, %v678_v26  ;;  %v379_v49 = vrot.slane %v667_v16, %v687_v34  ;;  %v383_v50 = vrot.slane %v669_v17, %v687_v34 }
  0x19   : > { %v387_v51 = vrot.slane %v671_v18, %v687_v34  ;;  %v391_v52 = vrot.slane %v673_v19, %v687_v34  ;;  %v407_v53 = vrot.slane %v667_v16, %v692_v40  ;;  %v411_v54 = vrot.slane %v669_v17, %v692_v40 }
  0x1a   : > { %v415_v55 = vrot.slane %v671_v18, %v692_v40  ;;  %v419_v56 = vrot.slane %v673_v19, %v692_v40  ;;  %v435_v59 = vrot.slane %v667_v16, %v697_v44  ;;  %v439_v60 = vrot.slane %v669_v17, %v697_v44 }
  0x1b   : > { %600 = vset.pattern.permute.xlu1 %v617_v10  ;;  %v443_v61 = vrot.slane %v671_v18, %v697_v44  ;;  %v447_v62 = vrot.slane %v673_v19, %v697_v44 }
  0x1c   : > { %429 = vperm.xlu1 %600, %v230_v3  }
  0x87   : > { %v290_v35 = vpop.permute.xlu1 %289  ;;  %v234_v36 = vpop.permute.xlu0 %233 }
  0x88   : > { %v252_v63 = vmul.f32 %v239_v28, %v234_v36  ;;  %v253_v0 = vmul.f32 %v243_v29, %v234_v36  ;;  %v254_v1 = vmul.f32 %v247_v30, %v234_v36  ;;  %v255_v2 = vmul.f32 %v251_v31, %v234_v36 }
  0x89   : > { %v308_v7 = vmul.f32 %v295_v23, %v290_v35  ;;  %v309_v8 = vmul.f32 %v299_v24, %v290_v35  ;;  %v310_v9 = vmul.f32 %v303_v25, %v290_v35  ;;  %v311_v10 = vmul.f32 %v307_v27, %v290_v35 }
  0x8c   : > { %v318_v57 = vpop.permute.xlu1 %317  ;;  %v262_v58 = vpop.permute.xlu0 %261 }
  0x8d   : > { %v280_v3 = vmul.f32 %v267_v39, %v262_v58  ;;  %v281_v4 = vmul.f32 %v271_v41, %v262_v58  ;;  %v282_v5 = vmul.f32 %v275_v42, %v262_v58  ;;  %v283_v6 = vmul.f32 %v279_v43, %v262_v58 }
  0x8e   : > { %v336_v15 = vmul.f32 %v323_v32, %v318_v57  ;;  %v337_v16 = vmul.f32 %v327_v33, %v318_v57  ;;  %v338_v17 = vmul.f32 %v331_v37, %v318_v57  ;;  %v339_v18 = vmul.f32 %v335_v38, %v318_v57 }
  0x8f   : > { %v284_v11 = vadd.f32 %v280_v3, %v252_v63  ;;  %v285_v12 = vadd.f32 %v281_v4, %v253_v0  ;;  %v286_v13 = vadd.f32 %v282_v5, %v254_v1  ;;  %v287_v14 = vadd.f32 %v283_v6, %v255_v2  ;;  %v466_v4 = vld [vmem:[%s215_s29] sm:$0xff]  ;;  %v467_v5 = vld [vmem:[%s215_s29 + $0x8] sm:$0xff]  ;;  %v468_v6 = vld [vmem:[%s215_s29 + $0x10] sm:$0xff] }
  0x91   : > { %v346_v19 = vpop.permute.xlu1 %345  ;;  %v312_v20 = vadd.f32 %v308_v7, %v284_v11  ;;  %v313_v21 = vadd.f32 %v309_v8, %v285_v12  ;;  %v314_v22 = vadd.f32 %v310_v9, %v286_v13  ;;  %v315_v26 = vadd.f32 %v311_v10, %v287_v14  ;;  %v374_v28 = vpop.permute.xlu0 %373  ;;  %v469_v7 = vld [vmem:[%s215_s29 + $0x18] sm:$0xff] }
  0x92   : > { %v364_v29 = vmul.f32 %v351_v45, %v346_v19  ;;  %v365_v30 = vmul.f32 %v355_v46, %v346_v19  ;;  %v366_v23 = vmul.f32 %v359_v47, %v346_v19  ;;  %v367_v24 = vmul.f32 %v363_v48, %v346_v19 }
  0x93   : > { %v340_v25 = vadd.f32 %v336_v15, %v312_v20  ;;  %v341_v27 = vadd.f32 %v337_v16, %v313_v21  ;;  %v342_v31 = vadd.f32 %v338_v17, %v314_v22  ;;  %v343_v34 = vadd.f32 %v339_v18, %v315_v26 }
  0x94   : > { %v392_v35 = vmul.f32 %v379_v49, %v374_v28  ;;  %v393_v36 = vmul.f32 %v383_v50, %v374_v28  ;;  %v394_v32 = vmul.f32 %v387_v51, %v374_v28  ;;  %v395_v33 = vmul.f32 %v391_v52, %v374_v28 }
  0x95   : > { %v368_v37 = vadd.f32 %v364_v29, %v340_v25  ;;  %v369_v38 = vadd.f32 %v365_v30, %v341_v27  ;;  %v370_v39 = vadd.f32 %v366_v23, %v342_v31  ;;  %v371_v40 = vadd.f32 %v367_v24, %v343_v34 }
  0x96   : > { %v402_v41 = vpop.permute.xlu1 %401 }
  0x97   : > { %v420_v42 = vmul.f32 %v407_v53, %v402_v41  ;;  %v421_v43 = vmul.f32 %v411_v54, %v402_v41  ;;  %v422_v44 = vmul.f32 %v415_v55, %v402_v41  ;;  %v423_v45 = vmul.f32 %v419_v56, %v402_v41  ;;  %v460_v55 = vpop.permute.xlu0 %459 }
  0x98   : > { %v396_v46 = vadd.f32 %v392_v35, %v368_v37  ;;  %v397_v47 = vadd.f32 %v393_v36, %v369_v38  ;;  %v398_v48 = vadd.f32 %v394_v32, %v370_v39  ;;  %v399_v57 = vadd.f32 %v395_v33, %v371_v40 }
  0x9a   : > { %v424_v49 = vadd.f32 %v420_v42, %v396_v46  ;;  %v425_v50 = vadd.f32 %v421_v43, %v397_v47  ;;  %v426_v51 = vadd.f32 %v422_v44, %v398_v48  ;;  %v427_v52 = vadd.f32 %v423_v45, %v399_v57 }
  0x9b   : > { %v430_v58 = vpop.permute.xlu1 %429 }
  0x9c   : > { %v448_v63 = vmul.f32 %v435_v59, %v430_v58  ;;  %v449_v0 = vmul.f32 %v439_v60, %v430_v58  ;;  %v450_v53 = vmul.f32 %v443_v61, %v430_v58  ;;  %v451_v54 = vmul.f32 %v447_v62, %v430_v58 }
  0x9e   : > { %v452_v56 = vadd.f32 %v448_v63, %v424_v49  ;;  %v453_v1 = vadd.f32 %v449_v0, %v425_v50  ;;  %v454_v2 = vadd.f32 %v450_v53, %v426_v51  ;;  %v455_v3 = vadd.f32 %v451_v54, %v427_v52 }
  0xa0   : > { %v462_v8 = vadd.f32 %v460_v55, %v452_v56  ;;  %v463_v9 = vadd.f32 %v460_v55, %v453_v1  ;;  %v464_v10 = vadd.f32 %v460_v55, %v454_v2  ;;  %v465_v11 = vadd.f32 %v460_v55, %v455_v3 }
  0xa2   : > { %v470_v12 = vadd.f32 %v466_v4, %v462_v8  ;;  %v471_v13 = vadd.f32 %v467_v5, %v463_v9  ;;  %v472_v59 = vadd.f32 %v468_v6, %v464_v10  ;;  %v473_v60 = vadd.f32 %v469_v7, %v465_v11 }
  0xa4   : > { %v575_v61 = vpack.c.bf16 %v471_v13, %v470_v12  ;;  %v576_v62 = vpack.c.bf16 %v473_v60, %v472_v59 }
  0xa6   : > { %490 = vst [vmem:[%s221_s6] sm:$0xff] %v575_v61  ;;  %491 = vst [vmem:[%s221_s6 + $0x8] sm:$0xff] %v576_v62 }
  0xa7 PF: > { %s14_s15 = sadd.s32 1, %s608_s15  }
  0xa8   : > { %p11_p4 = scmp.ge.s32.totalorder %s14_s15, 4  }
  0xaa   :  { %13 = sbr.rel (!%p11_p4) target bundleno = 1 (0x1), region = 69 }

// kernel: simple_block3d_forward.19
= control target key start
LH: loop header
LB: loop body
LE: loop exit
PB: predicated region body
PF: predicated region fallthrough
CT: control target
= control target key end

     0   :  { %s779_s18 = smov 0   ;;  %s900_s0 = inlined_call_operand.vmem [shape: bf16[8,1024], index: 0, kind: input, shape index: {}]   ;;  %s901_s1 = inlined_call_operand.vmem [shape: bf16[128,8], index: 1, kind: input, shape index: {}]   ;;  %s902_s2 = inlined_call_operand.vmem [shape: f32[128,1], index: 2, kind: input, shape index: {}]   ;;  %s903_s3 = inlined_call_operand.vmem [shape: bf16[3,128], index: 3, kind: input, shape index: {}]   ;;  %s904_s4 = inlined_call_operand.vmem [shape: f32[3,1], index: 4, kind: input, shape index: {}]   ;;  %s905_s5 = inlined_call_operand.vmem [shape: f32[3,1024], index: 5, kind: output, shape index: {}]  }
   0x1 LB: > { %s689_s19 = sadd.s32 4294967295, %s746_s18   ;;  %p693_p0 = scmp.ge.s32.totalorder %s746_s18, 1  ;;  %s746_s18 = sphi %s779_s18, %s15_s18  }
   0x2   : > { %p188_p1 = scmp.lt.s32.totalorder %s746_s18, 5 }
   0x4   : > { %p189_p2 = pnand %p693_p0, %p188_p1 }
   0x5   : > { %s694_s20 = sshll.u32 (!%p189_p2), %s689_s19, 1  ;;  %v748_v0 = vmov (!%p189_p2), 0   ;;  %vm412_vm0 = vcmask (!%p189_p2), 1043456   ;;  %v246_v4 = vld [vmem:[%s902_s2] sm:$0xff] (!%p189_p2)  ;;  %v248_v5 = vld [vmem:[%s902_s2 + $0x10] sm:$0xff] (!%p189_p2)  ;;  %vm387_vm1 = vcmask (!%p189_p2), 64512  }
   0x6   : > { %192 = sbr.rel (%p189_p2) target bundleno = 522 (0x20a), region = 40  ;;  %p217_p3 = scmp.lt.s32.totalorder (!%p189_p2), %s694_s20, 7  ;;  %451 = vmatprep.mubr.bf16.mxu0 (!%p189_p2), %v748_v0  ;;  %728 = vset.pattern.permute.xlu0 (!%p189_p2), %v748_v0  ;;  %v732_v7 = vld [vmem:[%s901_s1] sm:$0xff] (!%p189_p2)   ;;  %v247_v8 = vld [vmem:[%s902_s2 + $0x8] sm:$0xff] (!%p189_p2)  ;;  %v249_v9 = vld [vmem:[%s902_s2 + $0x18] sm:$0xff] (!%p189_p2) }
   0x7   : > { %729 = vset.pattern.permute.xlu1 (!%p189_p2), %v748_v0  ;;  %619 = vmatprep.mubr.bf16.mxu1 (!%p189_p2), %v748_v0  ;;  %v250_v10 = vld [vmem:[%s902_s2 + $0x20] sm:$0xff] (!%p189_p2)  ;;  %v251_v11 = vld [vmem:[%s902_s2 + $0x28] sm:$0xff] (!%p189_p2)  ;;  %v252_v13 = vld [vmem:[%s902_s2 + $0x30] sm:$0xff] (!%p189_p2) }
   0x8   : > { %264 = vperm.xlu0 (!%p189_p2), %728, %v246_v4   ;;  %274 = vperm.xlu1 (!%p189_p2), %729, %v248_v5   ;;  %v733_v12 = vld [vmem:[%s901_s1 + $0x8] sm:$0xff] (!%p189_p2)   ;;  %v253_v14 = vld [vmem:[%s902_s2 + $0x38] sm:$0xff] (!%p189_p2)  ;;  %v254_v15 = vld [vmem:[%s902_s2 + $0x40] sm:$0xff] (!%p189_p2) }
   0x9   : > { %v255_v16 = vld [vmem:[%s902_s2 + $0x48] sm:$0xff] (!%p189_p2)  ;;  %v734_v17 = vld [vmem:[%s901_s1 + $0x10] sm:$0xff] (!%p189_p2)   ;;  %v257_v19 = vld [vmem:[%s902_s2 + $0x58] sm:$0xff] (!%p189_p2) }
   0xa   : > { %v256_v18 = vld [vmem:[%s902_s2 + $0x50] sm:$0xff] (!%p189_p2)  ;;  %v258_v20 = vld [vmem:[%s902_s2 + $0x60] sm:$0xff] (!%p189_p2)  ;;  %v259_v21 = vld [vmem:[%s902_s2 + $0x68] sm:$0xff] (!%p189_p2) }
   0xb   : > { %v735_v22 = vld [vmem:[%s901_s1 + $0x18] sm:$0xff] (!%p189_p2)   ;;  %v260_v23 = vld [vmem:[%s902_s2 + $0x70] sm:$0xff] (!%p189_p2)  ;;  %v581_v25 = vld [vmem:[%s904_s4] sm:$0x7] (!%p189_p2) }
   0xc   : > { %269 = vperm.xlu0 (!%p189_p2), %728, %v247_v8   ;;  %279 = vperm.xlu1 (!%p189_p2), %729, %v249_v9   ;;  %v261_v24 = vld [vmem:[%s902_s2 + $0x78] sm:$0xff] (!%p189_p2)  ;;  %v736_v26 = vld [vmem:[%s901_s1 + $0x20] sm:$0xff] (!%p189_p2)   ;;  %v737_v27 = vld [vmem:[%s901_s1 + $0x28] sm:$0xff] (!%p189_p2)  }
   0xd   : > { %s907_s20 = smov (!%p217_p3, %s694_s20), 7  ;;  %v738_v28 = vld [vmem:[%s901_s1 + $0x30] sm:$0xff]   ;;  %v739_v29 = vld [vmem:[%s901_s1 + $0x38] sm:$0xff]  }
   0xe   : > { %s695_s21 = sshll.u32 %s907_s20, 2 }
   0xf   : > { %s220_s24 = scalar_lea.vmem %s900_s0, %s695_s21  ;;  %s226_s10 = scalar_lea.vmem %s905_s5, %s695_s21 }
  0x10   : > { %v229_v1 = vld [vmem:[%s220_s24] sm:$0xff]  ;;  %284 = vperm.xlu0 %728, %v250_v10   ;;  %289 = vperm.xlu1 %729, %v251_v11  }
  0x11   : > { %v707_v2 = vcombine.high %v229_v1, %v229_v1  ;;  %v706_v3 = vcombine.low %v229_v1, %v229_v1 }
  0x13   : > { %708 = vmatprep.subr.msk.bf16.mxu0 %vm412_vm0, %v707_v2  ;;  %v414_v6 = vsel %vm412_vm0, %v706_v3, 0 }
  0x14   : > { %420 = vmatpush1.bf16.msra.mxu0 %v414_v6  ;;  %294 = vperm.xlu0 %728, %v252_v13  }
  0x15   : > { %299 = vperm.xlu1 %729, %v253_v14  }
  0x17   : > { %709 = vmatmul.mubr.msk.bf16.vlgmr.msra.gmra.mrb[0].mxu0 %vm387_vm1, %v732_v7 }
  0x18   : > { %461 = vmatprep.mubr.bf16.mxu0 %v748_v0  ;;  %304 = vperm.xlu0 %728, %v254_v15  }
  0x19   : > { %309 = vperm.xlu1 %729, %v255_v16  }
  0x1c   : > { %314 = vperm.xlu0 %728, %v256_v18  }
  0x1d   : > { %319 = vperm.xlu1 %729, %v257_v19  }
  0x1f   : > { %710 = vmatmul.mubr.msk.bf16.gmra.mrb[4].mxu0 %vm387_vm1, %v733_v12 }
  0x20   : > { %471 = vmatprep.mubr.bf16.mxu0 %v748_v0  ;;  %324 = vperm.xlu0 %728, %v258_v20  }
  0x21   : > { %329 = vperm.xlu1 %729, %v259_v21  }
  0x24   : > { %334 = vperm.xlu0 %728, %v260_v23  }
  0x25   : > { %339 = vperm.xlu1 %729, %v261_v24  }
  0x27   : > { %711 = vmatmul.mubr.msk.bf16.gmra.mrb[8].mxu0 %vm387_vm1, %v734_v17 }
  0x28   : > { %481 = vmatprep.mubr.bf16.mxu0 %v748_v0  ;;  %584 = vperm.xlu0 %728, %v581_v25  }
  0x2f   : > { %712 = vmatmul.mubr.msk.bf16.gmra.mrb[12].mxu0 %vm387_vm1, %v735_v22 }
  0x30   : > { %491 = vmatprep.mubr.bf16.mxu0 %v748_v0 }
  0x37   : > { %713 = vmatmul.mubr.msk.bf16.gmra.mrb[16].mxu0 %vm387_vm1, %v736_v26 }
  0x38   : > { %501 = vmatprep.mubr.bf16.mxu0 %v748_v0 }
  0x3f   : > { %714 = vmatmul.mubr.msk.bf16.gmra.mrb[20].mxu0 %vm387_vm1, %v737_v27 }
  0x40   : > { %511 = vmatprep.mubr.bf16.mxu0 %v748_v0 }
  0x47   : > { %715 = vmatmul.mubr.msk.bf16.gmra.mrb[24].mxu0 %vm387_vm1, %v738_v28 }
  0x48   : > { %521 = vmatprep.mubr.bf16.mxu0 %v748_v0 }
  0x4f   : > { %716 = vmatmul.mubr.msk.bf16.gmra.mrb[28].mxu0 %vm387_vm1, %v739_v29 }
  0x87   : > { %v265_v30 = vpop.permute.xlu0 %264  ;;  %v275_v39 = vpop.permute.xlu1 %274 }
  0x8b   : > { %v270_v34 = vpop.permute.xlu0 %269  ;;  %v280_v50 = vpop.permute.xlu1 %279 }
  0x8f   : > { %v285_v61 = vpop.permute.xlu0 %284  ;;  %v290_v2 = vpop.permute.xlu1 %289 }
  0x93   : > { %v295_v13 = vpop.permute.xlu0 %294 }
  0x94   : > { %v300_v18 = vpop.permute.xlu1 %299 }
  0x97   : > { %v305_v29 = vpop.permute.xlu0 %304 }
  0xea   : > { %v453_v31 = vpop.f32.mrb[0].mxu0 }
  0xeb   : > { %v454_v32 = vadd.f32 %v453_v31, %v265_v30  ;;  %v455_v33 = vpop.f32.mrb[1].mxu0 }
  0xec   : > { %v456_v35 = vadd.f32 %v455_v33, %v265_v30  ;;  %v457_v36 = vpop.f32.mrb[2].mxu0 }
  0xed   : > { %v458_v37 = vadd.f32 %v457_v36, %v270_v34  ;;  %v459_v38 = vpop.f32.mrb[3].mxu0  ;;  %v532_v41 = vmax.f32 %v454_v32, 0.0 }
  0xee   : > { %v460_v40 = vadd.f32 %v459_v38, %v270_v34  ;;  %v533_v43 = vmax.f32 %v456_v35, 0.0  ;;  %v310_v34 = vpop.permute.xlu1 %309 }
  0xef   : > { %v534_v42 = vmax.f32 %v458_v37, 0.0 }
  0xf0   : > { %v535_v44 = vmax.f32 %v460_v40, 0.0 }
  0xf1   : > { %v565_v45 = vpack.c.bf16 %v534_v42, %v532_v41 }
  0xf2   : > { %v463_v46 = vpop.f32.mrb[4].mxu0  ;;  %v566_v47 = vpack.c.bf16 %v535_v44, %v533_v43 }
  0xf3   : > { %v464_v48 = vadd.f32 %v463_v46, %v275_v39  ;;  %v465_v49 = vpop.f32.mrb[5].mxu0 }
  0xf4   : > { %v466_v51 = vadd.f32 %v465_v49, %v275_v39  ;;  %v467_v52 = vpop.f32.mrb[6].mxu0  ;;  %587 = vmatprep.subr.bf16.mxu1 %v566_v47 }
  0xf5   : > { %v468_v53 = vadd.f32 %v467_v52, %v280_v50  ;;  %v469_v54 = vpop.f32.mrb[7].mxu0  ;;  %588 = vmatpush1.bf16.msra.mxu1 %v565_v45  ;;  %v536_v56 = vmax.f32 %v464_v48, 0.0  ;;  %v315_v45 = vpop.permute.xlu0 %314 }
  0xf6   : > { %v470_v55 = vadd.f32 %v469_v54, %v280_v50  ;;  %v537_v58 = vmax.f32 %v466_v51, 0.0  ;;  %v320_v50 = vpop.permute.xlu1 %319 }
  0xf7   : > { %v538_v57 = vmax.f32 %v468_v53, 0.0 }
  0xf8   : > { %v539_v59 = vmax.f32 %v470_v55, 0.0 }
  0xf9   : > { %v567_v60 = vpack.c.bf16 %v538_v57, %v536_v56 }
  0xfa   : > { %v568_v62 = vpack.c.bf16 %v539_v59, %v537_v58  ;;  %v473_v63 = vpop.f32.mrb[8].mxu0 }
  0xfb   : > { %v474_v0 = vadd.f32 %v473_v63, %v285_v61  ;;  %v475_v1 = vpop.f32.mrb[9].mxu0 }
  0xfc   : > { %v476_v3 = vadd.f32 %v475_v1, %v285_v61  ;;  %v477_v4 = vpop.f32.mrb[10].mxu0  ;;  %589 = vmatprep.subr.bf16.mxu1 %v568_v62  ;;  %v325_v61 = vpop.permute.xlu0 %324 }
  0xfd   : > { %v478_v5 = vadd.f32 %v477_v4, %v290_v2  ;;  %v479_v6 = vpop.f32.mrb[11].mxu0  ;;  %590 = vmatpush1.bf16.msra.mxu1 %v567_v60  ;;  %v540_v8 = vmax.f32 %v474_v0, 0.0 }
  0xfe   : > { %v480_v7 = vadd.f32 %v479_v6, %v290_v2  ;;  %v541_v10 = vmax.f32 %v476_v3, 0.0  ;;  %v330_v2 = vpop.permute.xlu1 %329 }
  0xff   : > { %v542_v9 = vmax.f32 %v478_v5, 0.0 }
 0x100   : > { %v543_v11 = vmax.f32 %v480_v7, 0.0 }
 0x101   : > { %v569_v12 = vpack.c.bf16 %v542_v9, %v540_v8 }
 0x102   : > { %v570_v14 = vpack.c.bf16 %v543_v11, %v541_v10  ;;  %v483_v15 = vpop.f32.mrb[12].mxu0 }
 0x103   : > { %v484_v16 = vadd.f32 %v483_v15, %v295_v13  ;;  %v485_v17 = vpop.f32.mrb[13].mxu0 }
 0x104   : > { %v486_v19 = vadd.f32 %v485_v17, %v295_v13  ;;  %v487_v20 = vpop.f32.mrb[14].mxu0  ;;  %591 = vmatprep.subr.bf16.mxu1 %v570_v14  ;;  %v335_v13 = vpop.permute.xlu0 %334 }
 0x105   : > { %v488_v21 = vadd.f32 %v487_v20, %v300_v18  ;;  %v489_v22 = vpop.f32.mrb[15].mxu0  ;;  %592 = vmatpush1.bf16.msra.mxu1 %v569_v12  ;;  %v544_v24 = vmax.f32 %v484_v16, 0.0 }
 0x106   : > { %v490_v23 = vadd.f32 %v489_v22, %v300_v18  ;;  %v545_v26 = vmax.f32 %v486_v19, 0.0  ;;  %v340_v18 = vpop.permute.xlu1 %339 }
 0x107   : > { %v546_v25 = vmax.f32 %v488_v21, 0.0 }
 0x108   : > { %v547_v27 = vmax.f32 %v490_v23, 0.0 }
 0x109   : > { %v571_v28 = vpack.c.bf16 %v546_v25, %v544_v24 }
 0x10a   : > { %v572_v30 = vpack.c.bf16 %v547_v27, %v545_v26  ;;  %v493_v31 = vpop.f32.mrb[16].mxu0 }
 0x10b   : > { %v494_v32 = vadd.f32 %v493_v31, %v305_v29  ;;  %v495_v33 = vpop.f32.mrb[17].mxu0  ;;  %v585_v31 = vpop.permute.xlu0 %584 }
 0x10c   : > { %v496_v35 = vadd.f32 %v495_v33, %v305_v29  ;;  %v497_v36 = vpop.f32.mrb[18].mxu0  ;;  %593 = vmatprep.subr.bf16.mxu1 %v572_v30  ;;  %v564_v30 = vld [vmem:[%s903_s3] sm:$0x3] }
 0x10d   : > { %v498_v37 = vadd.f32 %v497_v36, %v310_v34  ;;  %v499_v38 = vpop.f32.mrb[19].mxu0  ;;  %594 = vmatpush1.bf16.msra.mxu1 %v571_v28  ;;  %v548_v40 = vmax.f32 %v494_v32, 0.0 }
 0x10e   : > { %v500_v39 = vadd.f32 %v499_v38, %v310_v34  ;;  %v549_v42 = vmax.f32 %v496_v35, 0.0 }
 0x10f   : > { %v550_v41 = vmax.f32 %v498_v37, 0.0 }
 0x110   : > { %v551_v43 = vmax.f32 %v500_v39, 0.0 }
 0x111   : > { %v573_v44 = vpack.c.bf16 %v550_v41, %v548_v40 }
 0x112   : > { %v574_v46 = vpack.c.bf16 %v551_v43, %v549_v42  ;;  %v503_v47 = vpop.f32.mrb[20].mxu0 }
 0x113   : > { %v504_v48 = vadd.f32 %v503_v47, %v315_v45  ;;  %v505_v49 = vpop.f32.mrb[21].mxu0 }
 0x114   : > { %v506_v51 = vadd.f32 %v505_v49, %v315_v45  ;;  %v507_v52 = vpop.f32.mrb[22].mxu0  ;;  %595 = vmatprep.subr.bf16.mxu1 %v574_v46 }
 0x115   : > { %v508_v53 = vadd.f32 %v507_v52, %v320_v50  ;;  %v509_v54 = vpop.f32.mrb[23].mxu0  ;;  %596 = vmatpush1.bf16.msra.mxu1 %v573_v44  ;;  %v552_v56 = vmax.f32 %v504_v48, 0.0 }
 0x116   : > { %v510_v55 = vadd.f32 %v509_v54, %v320_v50  ;;  %v553_v58 = vmax.f32 %v506_v51, 0.0 }
 0x117   : > { %v554_v57 = vmax.f32 %v508_v53, 0.0 }
 0x118   : > { %v555_v59 = vmax.f32 %v510_v55, 0.0 }
 0x119   : > { %v575_v60 = vpack.c.bf16 %v554_v57, %v552_v56 }
 0x11a   : > { %v576_v62 = vpack.c.bf16 %v555_v59, %v553_v58  ;;  %v513_v63 = vpop.f32.mrb[24].mxu0 }
 0x11b   : > { %v514_v0 = vadd.f32 %v513_v63, %v325_v61  ;;  %v515_v1 = vpop.f32.mrb[25].mxu0 }
 0x11c   : > { %v516_v3 = vadd.f32 %v515_v1, %v325_v61  ;;  %v517_v4 = vpop.f32.mrb[26].mxu0  ;;  %597 = vmatprep.subr.bf16.mxu1 %v576_v62 }
 0x11d   : > { %v518_v5 = vadd.f32 %v517_v4, %v330_v2  ;;  %v519_v6 = vpop.f32.mrb[27].mxu0  ;;  %598 = vmatpush1.bf16.msra.mxu1 %v575_v60  ;;  %v556_v8 = vmax.f32 %v514_v0, 0.0 }
 0x11e   : > { %v520_v7 = vadd.f32 %v519_v6, %v330_v2  ;;  %v557_v10 = vmax.f32 %v516_v3, 0.0 }
 0x11f   : > { %v558_v9 = vmax.f32 %v518_v5, 0.0 }
 0x120   : > { %v559_v11 = vmax.f32 %v520_v7, 0.0 }
 0x121   : > { %v577_v12 = vpack.c.bf16 %v558_v9, %v556_v8 }
 0x122   : > { %v578_v14 = vpack.c.bf16 %v559_v11, %v557_v10  ;;  %v523_v15 = vpop.f32.mrb[28].mxu0 }
 0x123   : > { %v524_v16 = vadd.f32 %v523_v15, %v335_v13  ;;  %v525_v17 = vpop.f32.mrb[29].mxu0 }
 0x124   : > { %v526_v19 = vadd.f32 %v525_v17, %v335_v13  ;;  %v527_v20 = vpop.f32.mrb[30].mxu0  ;;  %599 = vmatprep.subr.bf16.mxu1 %v578_v14 }
 0x125   : > { %v528_v21 = vadd.f32 %v527_v20, %v340_v18  ;;  %v529_v22 = vpop.f32.mrb[31].mxu0  ;;  %600 = vmatpush1.bf16.msra.mxu1 %v577_v12  ;;  %v560_v24 = vmax.f32 %v524_v16, 0.0 }
 0x126   : > { %v530_v23 = vadd.f32 %v529_v22, %v340_v18  ;;  %v561_v26 = vmax.f32 %v526_v19, 0.0 }
 0x127   : > { %v562_v25 = vmax.f32 %v528_v21, 0.0 }
 0x128   : > { %v563_v27 = vmax.f32 %v530_v23, 0.0 }
 0x129   : > { %v579_v28 = vpack.c.bf16 %v562_v25, %v560_v24 }
 0x12a   : > { %v580_v29 = vpack.c.bf16 %v563_v27, %v561_v26 }
 0x12c   : > { %601 = vmatprep.subr.bf16.mxu1 %v580_v29 }
 0x12d   : > { %602 = vmatpush1.bf16.msra.mxu1 %v579_v28 }
 0x130   : > { %620 = vmatmul.mubr.bf16.vlgmr.msra.gmra.mrb[0].mxu1 %v564_v30 }
 0x203   : > { %v621_v32 = vpop.f32.mrb[0].mxu1 }
 0x204   : > { %v622_v33 = vadd.f32 %v621_v32, %v585_v31  ;;  %v623_v34 = vpop.f32.mrb[1].mxu1 }
 0x205   : > { %v624_v35 = vadd.f32 %v623_v34, %v585_v31  ;;  %v625_v36 = vpop.f32.mrb[2].mxu1 }
 0x206   : > { %v626_v37 = vpop.f32.mrb[3].mxu1 }
 0x207   : > { %v630_v38 = vcombine.low %v622_v33, %v624_v35 }
 0x209   : > { %632 = vst [vmem:[%s226_s10] sm:$0x77] %v630_v38 }
 0x20a PF: > { %s15_s18 = sadd.s32 1, %s746_s18  }
 0x20b   : > { %p12_p4 = scmp.ge.s32.totalorder %s15_s18, 6  }
 0x20d   :  { %14 = sbr.rel (!%p12_p4) target bundleno = 1 (0x1), region = 70 }

</bundles_post_ra>
